<compile_context>
chip_gen: v7x
topology: tpu7x:2x2x1
jax: 0.10.0
libtpu: 0.0.40
codegen_flags: <defaults>
</compile_context>

<pallas_src>
import jax
import jax.numpy as jnp
from jax import lax
from jax.experimental import pallas as pl
from jax.experimental.pallas import tpu as pltpu


def _bf16_eup_ok():
    """bf16 VPU/EUP activations are a win on v6e/v7x; v5e/v4 lack the bf16 path."""
    try:
        kind = jax.devices()[0].device_kind.lower()
    except Exception:
        return False
    return any(tag in kind for tag in ("v6", "v7"))


def _make_bilstm_top_kernel(H2, use_bf16_act):
    """Fused packed-sequence BiLSTM recurrence + top_path linear (kernel factory)."""
    S = 2 * H2            # state width per step ([h_f | h_b]) == dim_hidden
    G = 8 * H2            # gate lanes; == 128 at dim_hidden == 32 (lane-dense tile)

    def kernel(x_ref, len_ref, wx_ref, wh_ref, b_ref, wtop_ref, btop_ref, label_ref):
        # x_ref    : (T*B, E)  bf16 time-major path embeddings (flattened over (T, B))
        # len_ref  : (B, 1)    int32 sequence lengths
        # wx_ref   : (E, G)    bf16 input->gate, gate blocks [f,i,o,g], each [fwd|bwd];
        #                      g columns pre-scaled by 2
        # wh_ref   : (P, G)    bf16 block-diagonal hidden->gate, rows >= S are zero
        # b_ref    : (1, G)    f32 gate bias (g columns pre-scaled by 2)
        # wtop_ref : (P, P)    bf16 top_path weight, rows >= S / cols >= dim_out zero
        # btop_ref : (1, P)    f32 top_path bias (cols >= dim_out zero)
        # label_ref: (B, P)    f32 lane-dense output tile
        B = len_ref.shape[0]
        T = x_ref.shape[0] // B
        P = wh_ref.shape[0]

        # ---- all T input projections in ONE MXU matmul (bf16 operands, f32 acc) ----
        xg = (jnp.dot(x_ref[...], wx_ref[...], preferred_element_type=jnp.float32)
              + b_ref[...])                                     # (T*B, G) f32

        # ---- hoisted loop invariants ----
        wh = wh_ref[...]                                        # (P, G) bf16
        lengths = len_ref[...]                                  # (B, 1) int32
        lane_g = lax.broadcasted_iota(jnp.int32, (B, G), 1)
        is_fwd_gate = (lane_g % S) < H2                         # fwd-direction gate lanes
        is_tanh_gate = lane_g >= 6 * H2                         # g-gate block (last S lanes)
        # tanh(z) = 2*sigmoid(2z) - 1 via one sigmoid + one FMA (constants hoisted).
        act_scale = jnp.where(is_tanh_gate, 2.0, 1.0)
        act_shift = jnp.where(is_tanh_gate, -1.0, 0.0)
        lane_p = lax.broadcasted_iota(jnp.int32, (B, P), 1)
        is_fwd_state = (lane_p % S) < H2

        # Per-step merged x-projection: fwd lanes from time t, bwd lanes from T-1-t.
        xg_steps = [
            jnp.where(is_fwd_gate,
                      xg[t * B:(t + 1) * B, :],
                      xg[(T - 1 - t) * B:(T - t) * B, :])
            for t in range(T)
        ]
        # Packed-sequence update masks (fwd: t < len, bwd: T-1-t < len).
        step_masks = [
            jnp.where(is_fwd_state, t, T - 1 - t) < lengths
            for t in range(T)
        ]

        # Full-lane-tile state: only lanes [0, S) are meaningful ([h_f | h_b]); garbage
        # lanes stay finite (activations bounded) and are killed by the zero rows of
        # wh / wtop, so no narrow slicing appears on the serial chain.
        h = jnp.zeros((B, P), jnp.float32)
        c = jnp.zeros((B, P), jnp.float32)

        # Fully unrolled recurrence: one (B,P)@(P,G) bf16 matmul + one sigmoid per step.
        for t in range(T):
            gates = xg_steps[t] + jnp.dot(h.astype(wh.dtype), wh,
                                          preferred_element_type=jnp.float32)
            if use_bf16_act:          # bf16 EUP path (v6e / v7x only)
                s_act = jax.nn.sigmoid(gates.astype(jnp.bfloat16)).astype(jnp.float32)
            else:
                s_act = jax.nn.sigmoid(gates)
            act = s_act * act_scale + act_shift     # sigmoid / tanh per lane block
            # Gate realignment on the XLU (no lane-narrow slices).  Block order is
            # [f, i, o, g]: roll-by-2S lands o at lanes [0,S) under either rotate
            # convention, and the i/g pair only enters as a commutative product.
            f_g = act
            r1 = pltpu.roll(act, shift=S, axis=1)
            o_g = pltpu.roll(act, shift=2 * S, axis=1)
            r3 = pltpu.roll(act, shift=3 * S, axis=1)
            c_new = f_g * c + r1 * r3
            h_new = o_g * jnp.tanh(c_new)
            m = step_masks[t]
            h = jnp.where(m, h_new, h)
            c = jnp.where(m, c_new, c)

        # h lanes [0, S) are already [h_fwd_final | h_bwd_final]; zero-padded wtop rows
        # kill garbage lanes, padded output lanes keep the final store full-width.
        label_ref[...] = (jnp.dot(h.astype(wtop_ref.dtype), wtop_ref[...],
                                  preferred_element_type=jnp.float32)
                          + btop_ref[...])

    return kernel


def _pack_gates(w_f, w_b, H2, g_scale=2.0):
    """Repack per-direction [i,f,g,o] gate columns into the kernel's lane layout.

    Output gate-block order is [f, i, o, g] (each block direction-interleaved as
    [fwd H2 | bwd H2]).  The g block is pre-scaled by `g_scale` so the kernel needs a
    single sigmoid (tanh(z) = 2*sigmoid(2z) - 1); the [f,i,o,g] order makes the
    in-kernel roll-based gate realignment independent of the rotate direction.
    """
    lead = w_f.shape[:-1]

    def split(w):
        w4 = w.reshape(lead + (4, H2))
        i, f, g, o = (w4[..., k, :] for k in range(4))
        return jnp.stack([f, i, o, g * g_scale], axis=-2)        # (.., 4, H2)

    return jnp.concatenate([split(w_f), split(w_b)], axis=-1).reshape(lead + (8 * H2,))


def embedding_reg_forward(params, path, word, lengths):
    emb_table = params["embedding"]                     # (num_embedding, E)
    word_emb = emb_table[word]                          # (B, E)   (glue: gather)
    # TODO(synk): at production vocab sizes, fuse the path/word gathers into the kernel
    # (scalar-prefetch indices into SMEM, table in HBM via memory_space=pl.ANY, per-row
    # async copies overlapped with the (T*B,E)@(E,128) matmul) to avoid the (B,T,E)
    # HBM round-trip; at these toy sizes the recurrence kernel dominates.

    B, T = path.shape
    E = emb_table.shape[1]
    H2 = params["whh_f"].shape[0]
    dim_out = params["b_top"].shape[-1]
    S = 2 * H2
    G = 8 * H2
    P = 128                                             # padded state / output lane width

    assert G == 128, "lane-dense gate layout assumes 8 * (dim_hidden // 2) == 128"
    assert B % 8 == 0, "batch must be a multiple of 8 for sublane-exact per-step slices"
    assert dim_out <= P

    # Gather time-major directly (transpose the int32 index matrix, not the float
    # activations) and hand the MXU bf16 operands; accumulation stays f32 in-kernel.
    x_flat = emb_table[path.T].reshape(T * B, E).astype(jnp.bfloat16)
    lengths_2d = lengths.astype(jnp.int32).reshape(B, 1)

    # Trace-time repack: lane-dense (E, 128) input projection, block-diagonal
    # hidden projection zero-padded to (128, 128), interleaved bias, padded top_path.
    wx_all = _pack_gates(params["wih_f"], params["wih_b"], H2).astype(jnp.bfloat16)
    b_all = _pack_gates(params["b_f"], params["b_b"], H2)                   # f32
    zeros_h = jnp.zeros_like(params["whh_f"])
    wh_all = jnp.concatenate(
        [_pack_gates(params["whh_f"], zeros_h, H2),
         _pack_gates(zeros_h, params["whh_b"], H2)], axis=0)                # (S, G)
    wh_pad = jnp.zeros((P, G), jnp.float32).at[:S].set(wh_all).astype(jnp.bfloat16)
    wtop_pad = (jnp.zeros((P, P), jnp.float32)
                .at[:S, :dim_out].set(params["w_top"])).astype(jnp.bfloat16)
    btop_pad = jnp.zeros((1, P), jnp.float32).at[:, :dim_out].set(params["b_top"])

    use_bf16_act = _bf16_eup_ok()

    vmem = pltpu.MemorySpace.VMEM
    label_pad = pl.pallas_call(
        _make_bilstm_top_kernel(H2, use_bf16_act),
        out_shape=jax.ShapeDtypeStruct((B, P), jnp.float32),
        in_specs=[pl.BlockSpec(memory_space=vmem)] * 7,
        out_specs=pl.BlockSpec(memory_space=vmem),
    )(x_flat, lengths_2d, wx_all, wh_pad, b_all, wtop_pad, btop_pad)
    # TODO(synk): on v7x (2 TensorCores) add a batch grid axis with
    # dimension_semantics=("parallel",) once B is large enough to be worth splitting.

    return word_emb, label_pad[:, :dim_out]


def reference_forward(params, path, word, lengths):
    """Pure-JAX f32 reference with identical packed-BiLSTM semantics."""
    emb_table = params["embedding"]
    path_emb = emb_table[path]                          # (B, T, E)
    word_emb = emb_table[word]
    B, T, _ = path_emb.shape
    H2 = params["whh_f"].shape[0]
    lengths = lengths.astype(jnp.int32).reshape(B, 1)

    def cell(x_t, h, c, wih, whh, b):
        gates = x_t @ wih + h @ whh + b
        i = jax.nn.sigmoid(gates[:, 0 * H2:1 * H2])
        f = jax.nn.sigmoid(gates[:, 1 * H2:2 * H2])
        g = jnp.tanh(gates[:, 2 * H2:3 * H2])
        o = jax.nn.sigmoid(gates[:, 3 * H2:4 * H2])
        c_new = f * c + i * g
        return o * jnp.tanh(c_new), c_new

    h_f = c_f = h_b = c_b = jnp.zeros((B, H2), jnp.float32)
    for t in range(T):
        hn, cn = cell(path_emb[:, t, :], h_f, c_f,
                      params["wih_f"], params["whh_f"], params["b_f"])
        m = (t < lengths).astype(jnp.float32)
        h_f = m * hn + (1 - m) * h_f
        c_f = m * cn + (1 - m) * c_f

        tb = T - 1 - t
        hn, cn = cell(path_emb[:, tb, :], h_b, c_b,
                      params["wih_b"], params["whh_b"], params["b_b"])
        m = (tb < lengths).astype(jnp.float32)
        h_b = m * hn + (1 - m) * h_b
        c_b = m * cn + (1 - m) * c_b

    h_cat = jnp.concatenate([h_f, h_b], axis=1)
    label = h_cat @ params["w_top"] + params["b_top"]
    return word_emb, label


def make_params(key, num_embedding, dim_embedding, dim_hidden, dim_out, padding_idx=0):
    H2 = dim_hidden // 2
    ks = jax.random.split(key, 9)
    scale = 0.1
    emb = jax.random.normal(ks[0], (num_embedding, dim_embedding), jnp.float32) * scale
    emb = emb.at[padding_idx].set(0.0)                  # padding_idx row is zero
    params = {
        "embedding": emb,
        # LSTM weights, pre-transposed to (in, out); gate order i,f,g,o.
        "wih_f": jax.random.normal(ks[1], (dim_embedding, 4 * H2), jnp.float32) * scale,
        "whh_f": jax.random.normal(ks[2], (H2, 4 * H2), jnp.float32) * scale,
        "b_f":   jax.random.normal(ks[3], (1, 4 * H2), jnp.float32) * scale,
        "wih_b": jax.random.normal(ks[4], (dim_embedding, 4 * H2), jnp.float32) * scale,
        "whh_b": jax.random.normal(ks[5], (H2, 4 * H2), jnp.float32) * scale,
        "b_b":   jax.random.normal(ks[6], (1, 4 * H2), jnp.float32) * scale,
        # top_path linear, pre-transposed to (dim_hidden, dim_out)
        "w_top": jax.random.normal(ks[7], (dim_hidden, dim_out), jnp.float32) * scale,
        "b_top": jax.random.normal(ks[8], (1, dim_out), jnp.float32) * scale,
    }
    return params


if __name__ == "__main__":
    # small shapes consistent with the module
    B, T = 8, 8                      # batch_size, max path len
    num_embedding = 64
    dim_embedding = 32
    dim_hidden = 32                  # H2 = 16 per direction; 8*H2 = 128 gate lanes
    dim_out = 16

    key = jax.random.PRNGKey(0)
    kp, kpath, kword, klen = jax.random.split(key, 4)
    params = make_params(kp, num_embedding, dim_embedding, dim_hidden, dim_out)

    lengths = jax.random.randint(klen, (B,), 1, T + 1, dtype=jnp.int32)
    path = jax.random.randint(kpath, (B, T), 1, num_embedding, dtype=jnp.int32)
    # zero-pad (padding_idx=0) positions beyond each sequence's length
    pos = jnp.arange(T)[None, :]
    path = jnp.where(pos < lengths[:, None], path, 0)
    word = jax.random.randint(kword, (B,), 1, num_embedding, dtype=jnp.int32)

    word_emb, label = embedding_reg_forward(params, path, word, lengths)
    word_emb, label = jax.block_until_ready((word_emb, label))

    ref_word_emb, ref_label = reference_forward(params, path, word, lengths)
    assert word_emb.shape == (B, dim_embedding)
    assert label.shape == (B, dim_out)
    assert jnp.allclose(word_emb, ref_word_emb, atol=1e-6, rtol=1e-6)
    # bf16 MXU operands (+ bf16 EUP activations on v6e/v7x) -> looser label tolerance.
    assert jnp.allclose(label, ref_label, atol=5e-2, rtol=5e-2)

    print("KERNEL_OK")
</pallas_src>

<mosaic_0001>
module attributes {stable_mosaic.version = 11 : i64} {
  func.func @kernel(%arg0: memref<64x32xbf16, #tpu.memory_space<vmem>>, %arg1: memref<8x1xi32, #tpu.memory_space<vmem>>, %arg2: memref<32x128xbf16, #tpu.memory_space<vmem>>, %arg3: memref<128x128xbf16, #tpu.memory_space<vmem>>, %arg4: memref<1x128xf32, #tpu.memory_space<vmem>>, %arg5: memref<128x128xbf16, #tpu.memory_space<vmem>>, %arg6: memref<1x128xf32, #tpu.memory_space<vmem>>, %arg7: memref<8x128xf32, #tpu.memory_space<vmem>>) attributes {dimension_semantics = [], scalar_prefetch = 0 : i64, scratch_operands = 0 : i64, tpu.core_type = #tpu.core_type<tc>} {
    %c0 = arith.constant 0 : index
    %c0_0 = arith.constant 0 : index
    %0 = vector.load %arg0[%c0, %c0_0] : memref<64x32xbf16, #tpu.memory_space<vmem>>, vector<64x32xbf16>
    %c0_1 = arith.constant 0 : index
    %c0_2 = arith.constant 0 : index
    %1 = vector.load %arg2[%c0_1, %c0_2] : memref<32x128xbf16, #tpu.memory_space<vmem>>, vector<32x128xbf16>
    %cst = arith.constant dense<0.000000e+00> : vector<64x128xf32>
    %2 = tpu.matmul %0, %1, %cst {dimension_numbers = #tpu.dot_dimension_numbers<[1], [0], [0], [1], [0, 0, 1, 1], [], []>} : vector<64x32xbf16>, vector<32x128xbf16>, vector<64x128xf32> -> vector<64x128xf32>
    %c0_3 = arith.constant 0 : index
    %c0_4 = arith.constant 0 : index
    %3 = vector.load %arg4[%c0_3, %c0_4] : memref<1x128xf32, #tpu.memory_space<vmem>>, vector<1x128xf32>
    %4 = vector.broadcast %3 : vector<1x128xf32> to vector<64x128xf32>
    %5 = arith.addf %2, %4 : vector<64x128xf32>
    %c0_5 = arith.constant 0 : index
    %c0_6 = arith.constant 0 : index
    %6 = vector.load %arg3[%c0_5, %c0_6] : memref<128x128xbf16, #tpu.memory_space<vmem>>, vector<128x128xbf16>
    %c0_7 = arith.constant 0 : index
    %c0_8 = arith.constant 0 : index
    %7 = vector.load %arg1[%c0_7, %c0_8] : memref<8x1xi32, #tpu.memory_space<vmem>>, vector<8x1xi32>
    %8 = tpu.iota {dimensions = array<i32: 1>} : vector<8x128xi32>
    %c32_i32 = arith.constant 32 : i32
    %c0_i32 = arith.constant 0 : i32
    %9 = arith.cmpi eq, %c32_i32, %c0_i32 : i32
    %c1_i32 = arith.constant 1 : i32
    %10 = arith.select %9, %c1_i32, %c32_i32 : i32
    %11 = vector.broadcast %10 : i32 to vector<8x128xi32>
    %12 = arith.remsi %8, %11 : vector<8x128xi32>
    %c0_i32_9 = arith.constant 0 : i32
    %13 = vector.broadcast %c0_i32_9 : i32 to vector<8x128xi32>
    %14 = arith.cmpi ne, %12, %13 : vector<8x128xi32>
    %c0_i32_10 = arith.constant 0 : i32
    %15 = vector.broadcast %c0_i32_10 : i32 to vector<8x128xi32>
    %16 = arith.cmpi slt, %12, %15 : vector<8x128xi32>
    %c0_i32_11 = arith.constant 0 : i32
    %17 = arith.cmpi slt, %10, %c0_i32_11 : i32
    %18 = vector.broadcast %17 : i1 to vector<8x128xi1>
    %19 = vector.broadcast %18 : vector<8x128xi1> to vector<8x128xi1>
    %20 = arith.xori %16, %19 : vector<8x128xi1>
    %21 = arith.andi %20, %14 : vector<8x128xi1>
    %22 = vector.broadcast %10 : i32 to vector<8x128xi32>
    %23 = arith.addi %12, %22 : vector<8x128xi32>
    %24 = arith.select %21, %23, %12 : vector<8x128xi1>, vector<8x128xi32>
    %c16_i32 = arith.constant 16 : i32
    %25 = vector.broadcast %c16_i32 : i32 to vector<8x128xi32>
    %26 = arith.cmpi slt, %24, %25 : vector<8x128xi32>
    %c96_i32 = arith.constant 96 : i32
    %27 = vector.broadcast %c96_i32 : i32 to vector<8x128xi32>
    %28 = arith.cmpi sge, %8, %27 : vector<8x128xi32>
    %cst_12 = arith.constant 2.000000e+00 : f32
    %cst_13 = arith.constant 1.000000e+00 : f32
    %29 = vector.broadcast %cst_12 : f32 to vector<8x128xf32>
    %30 = vector.broadcast %cst_13 : f32 to vector<8x128xf32>
    %31 = arith.select %28, %29, %30 : vector<8x128xi1>, vector<8x128xf32>
    %cst_14 = arith.constant -1.000000e+00 : f32
    %cst_15 = arith.constant 0.000000e+00 : f32
    %32 = vector.broadcast %cst_14 : f32 to vector<8x128xf32>
    %33 = vector.broadcast %cst_15 : f32 to vector<8x128xf32>
    %34 = arith.select %28, %32, %33 : vector<8x128xi1>, vector<8x128xf32>
    %35 = tpu.iota {dimensions = array<i32: 1>} : vector<8x128xi32>
    %c32_i32_16 = arith.constant 32 : i32
    %c0_i32_17 = arith.constant 0 : i32
    %36 = arith.cmpi eq, %c32_i32_16, %c0_i32_17 : i32
    %c1_i32_18 = arith.constant 1 : i32
    %37 = arith.select %36, %c1_i32_18, %c32_i32_16 : i32
    %38 = vector.broadcast %37 : i32 to vector<8x128xi32>
    %39 = arith.remsi %35, %38 : vector<8x128xi32>
    %c0_i32_19 = arith.constant 0 : i32
    %40 = vector.broadcast %c0_i32_19 : i32 to vector<8x128xi32>
    %41 = arith.cmpi ne, %39, %40 : vector<8x128xi32>
    %c0_i32_20 = arith.constant 0 : i32
    %42 = vector.broadcast %c0_i32_20 : i32 to vector<8x128xi32>
    %43 = arith.cmpi slt, %39, %42 : vector<8x128xi32>
    %c0_i32_21 = arith.constant 0 : i32
    %44 = arith.cmpi slt, %37, %c0_i32_21 : i32
    %45 = vector.broadcast %44 : i1 to vector<8x128xi1>
    %46 = vector.broadcast %45 : vector<8x128xi1> to vector<8x128xi1>
    %47 = arith.xori %43, %46 : vector<8x128xi1>
    %48 = arith.andi %47, %41 : vector<8x128xi1>
    %49 = vector.broadcast %37 : i32 to vector<8x128xi32>
    %50 = arith.addi %39, %49 : vector<8x128xi32>
    %51 = arith.select %48, %50, %39 : vector<8x128xi1>, vector<8x128xi32>
    %c16_i32_22 = arith.constant 16 : i32
    %52 = vector.broadcast %c16_i32_22 : i32 to vector<8x128xi32>
    %53 = arith.cmpi slt, %51, %52 : vector<8x128xi32>
    %54 = vector.extract_strided_slice %5 {offsets = [0, 0], sizes = [8, 128], strides = [1, 1]} : vector<64x128xf32> to vector<8x128xf32>
    %55 = vector.extract_strided_slice %5 {offsets = [56, 0], sizes = [8, 128], strides = [1, 1]} : vector<64x128xf32> to vector<8x128xf32>
    %56 = arith.select %26, %54, %55 : vector<8x128xi1>, vector<8x128xf32>
    %57 = vector.extract_strided_slice %5 {offsets = [8, 0], sizes = [8, 128], strides = [1, 1]} : vector<64x128xf32> to vector<8x128xf32>
    %58 = vector.extract_strided_slice %5 {offsets = [48, 0], sizes = [8, 128], strides = [1, 1]} : vector<64x128xf32> to vector<8x128xf32>
    %59 = arith.select %26, %57, %58 : vector<8x128xi1>, vector<8x128xf32>
    %60 = vector.extract_strided_slice %5 {offsets = [16, 0], sizes = [8, 128], strides = [1, 1]} : vector<64x128xf32> to vector<8x128xf32>
    %61 = vector.extract_strided_slice %5 {offsets = [40, 0], sizes = [8, 128], strides = [1, 1]} : vector<64x128xf32> to vector<8x128xf32>
    %62 = arith.select %26, %60, %61 : vector<8x128xi1>, vector<8x128xf32>
    %63 = vector.extract_strided_slice %5 {offsets = [24, 0], sizes = [8, 128], strides = [1, 1]} : vector<64x128xf32> to vector<8x128xf32>
    %64 = vector.extract_strided_slice %5 {offsets = [32, 0], sizes = [8, 128], strides = [1, 1]} : vector<64x128xf32> to vector<8x128xf32>
    %65 = arith.select %26, %63, %64 : vector<8x128xi1>, vector<8x128xf32>
    %66 = vector.extract_strided_slice %5 {offsets = [32, 0], sizes = [8, 128], strides = [1, 1]} : vector<64x128xf32> to vector<8x128xf32>
    %67 = vector.extract_strided_slice %5 {offsets = [24, 0], sizes = [8, 128], strides = [1, 1]} : vector<64x128xf32> to vector<8x128xf32>
    %68 = arith.select %26, %66, %67 : vector<8x128xi1>, vector<8x128xf32>
    %69 = vector.extract_strided_slice %5 {offsets = [40, 0], sizes = [8, 128], strides = [1, 1]} : vector<64x128xf32> to vector<8x128xf32>
    %70 = vector.extract_strided_slice %5 {offsets = [16, 0], sizes = [8, 128], strides = [1, 1]} : vector<64x128xf32> to vector<8x128xf32>
    %71 = arith.select %26, %69, %70 : vector<8x128xi1>, vector<8x128xf32>
    %72 = vector.extract_strided_slice %5 {offsets = [48, 0], sizes = [8, 128], strides = [1, 1]} : vector<64x128xf32> to vector<8x128xf32>
    %73 = vector.extract_strided_slice %5 {offsets = [8, 0], sizes = [8, 128], strides = [1, 1]} : vector<64x128xf32> to vector<8x128xf32>
    %74 = arith.select %26, %72, %73 : vector<8x128xi1>, vector<8x128xf32>
    %75 = vector.extract_strided_slice %5 {offsets = [56, 0], sizes = [8, 128], strides = [1, 1]} : vector<64x128xf32> to vector<8x128xf32>
    %76 = vector.extract_strided_slice %5 {offsets = [0, 0], sizes = [8, 128], strides = [1, 1]} : vector<64x128xf32> to vector<8x128xf32>
    %77 = arith.select %26, %75, %76 : vector<8x128xi1>, vector<8x128xf32>
    %c0_i32_23 = arith.constant 0 : i32
    %c7_i32 = arith.constant 7 : i32
    %78 = vector.broadcast %c0_i32_23 : i32 to vector<8x128xi32>
    %79 = vector.broadcast %c7_i32 : i32 to vector<8x128xi32>
    %80 = arith.select %53, %78, %79 : vector<8x128xi1>, vector<8x128xi32>
    %81 = vector.broadcast %7 : vector<8x1xi32> to vector<8x128xi32>
    %82 = arith.cmpi slt, %80, %81 : vector<8x128xi32>
    %c1_i32_24 = arith.constant 1 : i32
    %c6_i32 = arith.constant 6 : i32
    %83 = vector.broadcast %c1_i32_24 : i32 to vector<8x128xi32>
    %84 = vector.broadcast %c6_i32 : i32 to vector<8x128xi32>
    %85 = arith.select %53, %83, %84 : vector<8x128xi1>, vector<8x128xi32>
    %86 = vector.broadcast %7 : vector<8x1xi32> to vector<8x128xi32>
    %87 = arith.cmpi slt, %85, %86 : vector<8x128xi32>
    %c2_i32 = arith.constant 2 : i32
    %c5_i32 = arith.constant 5 : i32
    %88 = vector.broadcast %c2_i32 : i32 to vector<8x128xi32>
    %89 = vector.broadcast %c5_i32 : i32 to vector<8x128xi32>
    %90 = arith.select %53, %88, %89 : vector<8x128xi1>, vector<8x128xi32>
    %91 = vector.broadcast %7 : vector<8x1xi32> to vector<8x128xi32>
    %92 = arith.cmpi slt, %90, %91 : vector<8x128xi32>
    %c3_i32 = arith.constant 3 : i32
    %c4_i32 = arith.constant 4 : i32
    %93 = vector.broadcast %c3_i32 : i32 to vector<8x128xi32>
    %94 = vector.broadcast %c4_i32 : i32 to vector<8x128xi32>
    %95 = arith.select %53, %93, %94 : vector<8x128xi1>, vector<8x128xi32>
    %96 = vector.broadcast %7 : vector<8x1xi32> to vector<8x128xi32>
    %97 = arith.cmpi slt, %95, %96 : vector<8x128xi32>
    %c4_i32_25 = arith.constant 4 : i32
    %c3_i32_26 = arith.constant 3 : i32
    %98 = vector.broadcast %c4_i32_25 : i32 to vector<8x128xi32>
    %99 = vector.broadcast %c3_i32_26 : i32 to vector<8x128xi32>
    %100 = arith.select %53, %98, %99 : vector<8x128xi1>, vector<8x128xi32>
    %101 = vector.broadcast %7 : vector<8x1xi32> to vector<8x128xi32>
    %102 = arith.cmpi slt, %100, %101 : vector<8x128xi32>
    %c5_i32_27 = arith.constant 5 : i32
    %c2_i32_28 = arith.constant 2 : i32
    %103 = vector.broadcast %c5_i32_27 : i32 to vector<8x128xi32>
    %104 = vector.broadcast %c2_i32_28 : i32 to vector<8x128xi32>
    %105 = arith.select %53, %103, %104 : vector<8x128xi1>, vector<8x128xi32>
    %106 = vector.broadcast %7 : vector<8x1xi32> to vector<8x128xi32>
    %107 = arith.cmpi slt, %105, %106 : vector<8x128xi32>
    %c6_i32_29 = arith.constant 6 : i32
    %c1_i32_30 = arith.constant 1 : i32
    %108 = vector.broadcast %c6_i32_29 : i32 to vector<8x128xi32>
    %109 = vector.broadcast %c1_i32_30 : i32 to vector<8x128xi32>
    %110 = arith.select %53, %108, %109 : vector<8x128xi1>, vector<8x128xi32>
    %111 = vector.broadcast %7 : vector<8x1xi32> to vector<8x128xi32>
    %112 = arith.cmpi slt, %110, %111 : vector<8x128xi32>
    %c7_i32_31 = arith.constant 7 : i32
    %c0_i32_32 = arith.constant 0 : i32
    %113 = vector.broadcast %c7_i32_31 : i32 to vector<8x128xi32>
    %114 = vector.broadcast %c0_i32_32 : i32 to vector<8x128xi32>
    %115 = arith.select %53, %113, %114 : vector<8x128xi1>, vector<8x128xi32>
    %116 = vector.broadcast %7 : vector<8x1xi32> to vector<8x128xi32>
    %117 = arith.cmpi slt, %115, %116 : vector<8x128xi32>
    %cst_33 = arith.constant 0.000000e+00 : f32
    %118 = vector.broadcast %cst_33 : f32 to vector<8x128xf32>
    %cst_34 = arith.constant 0.000000e+00 : f32
    %119 = vector.broadcast %cst_34 : f32 to vector<8x128xf32>
    %120 = arith.truncf %118 : vector<8x128xf32> to vector<8x128xbf16>
    %cst_35 = arith.constant dense<0.000000e+00> : vector<8x128xf32>
    %121 = tpu.matmul %120, %6, %cst_35 {dimension_numbers = #tpu.dot_dimension_numbers<[1], [0], [0], [1], [0, 0, 1, 1], [], []>} : vector<8x128xbf16>, vector<128x128xbf16>, vector<8x128xf32> -> vector<8x128xf32>
    %122 = arith.addf %56, %121 : vector<8x128xf32>
    %123 = arith.negf %122 : vector<8x128xf32>
    %124 = math.exp %123 : vector<8x128xf32>
    %cst_36 = arith.constant 1.000000e+00 : f32
    %125 = vector.broadcast %cst_36 : f32 to vector<8x128xf32>
    %126 = arith.addf %125, %124 : vector<8x128xf32>
    %127 = arith.divf %125, %126 : vector<8x128xf32>
    %128 = arith.mulf %127, %31 : vector<8x128xf32>
    %129 = arith.addf %128, %34 : vector<8x128xf32>
    %c32_i32_37 = arith.constant 32 : i32
    %130 = tpu.dynamic_rotate %129 by %c32_i32_37 dim 1 : vector<8x128xf32>, i32 -> vector<8x128xf32>
    %c64_i32 = arith.constant 64 : i32
    %131 = tpu.dynamic_rotate %129 by %c64_i32 dim 1 : vector<8x128xf32>, i32 -> vector<8x128xf32>
    %c96_i32_38 = arith.constant 96 : i32
    %132 = tpu.dynamic_rotate %129 by %c96_i32_38 dim 1 : vector<8x128xf32>, i32 -> vector<8x128xf32>
    %133 = arith.mulf %129, %119 : vector<8x128xf32>
    %134 = arith.mulf %130, %132 : vector<8x128xf32>
    %135 = arith.addf %133, %134 : vector<8x128xf32>
    %136 = math.tanh %135 : vector<8x128xf32>
    %137 = arith.mulf %131, %136 : vector<8x128xf32>
    %138 = arith.select %82, %137, %118 : vector<8x128xi1>, vector<8x128xf32>
    %139 = arith.select %82, %135, %119 : vector<8x128xi1>, vector<8x128xf32>
    %140 = arith.truncf %138 : vector<8x128xf32> to vector<8x128xbf16>
    %cst_39 = arith.constant dense<0.000000e+00> : vector<8x128xf32>
    %141 = tpu.matmul %140, %6, %cst_39 {dimension_numbers = #tpu.dot_dimension_numbers<[1], [0], [0], [1], [0, 0, 1, 1], [], []>} : vector<8x128xbf16>, vector<128x128xbf16>, vector<8x128xf32> -> vector<8x128xf32>
    %142 = arith.addf %59, %141 : vector<8x128xf32>
    %143 = arith.negf %142 : vector<8x128xf32>
    %144 = math.exp %143 : vector<8x128xf32>
    %cst_40 = arith.constant 1.000000e+00 : f32
    %145 = vector.broadcast %cst_40 : f32 to vector<8x128xf32>
    %146 = arith.addf %145, %144 : vector<8x128xf32>
    %147 = arith.divf %145, %146 : vector<8x128xf32>
    %148 = arith.mulf %147, %31 : vector<8x128xf32>
    %149 = arith.addf %148, %34 : vector<8x128xf32>
    %c32_i32_41 = arith.constant 32 : i32
    %150 = tpu.dynamic_rotate %149 by %c32_i32_41 dim 1 : vector<8x128xf32>, i32 -> vector<8x128xf32>
    %c64_i32_42 = arith.constant 64 : i32
    %151 = tpu.dynamic_rotate %149 by %c64_i32_42 dim 1 : vector<8x128xf32>, i32 -> vector<8x128xf32>
    %c96_i32_43 = arith.constant 96 : i32
    %152 = tpu.dynamic_rotate %149 by %c96_i32_43 dim 1 : vector<8x128xf32>, i32 -> vector<8x128xf32>
    %153 = arith.mulf %149, %139 : vector<8x128xf32>
    %154 = arith.mulf %150, %152 : vector<8x128xf32>
    %155 = arith.addf %153, %154 : vector<8x128xf32>
    %156 = math.tanh %155 : vector<8x128xf32>
    %157 = arith.mulf %151, %156 : vector<8x128xf32>
    %158 = arith.select %87, %157, %138 : vector<8x128xi1>, vector<8x128xf32>
    %159 = arith.select %87, %155, %139 : vector<8x128xi1>, vector<8x128xf32>
    %160 = arith.truncf %158 : vector<8x128xf32> to vector<8x128xbf16>
    %cst_44 = arith.constant dense<0.000000e+00> : vector<8x128xf32>
    %161 = tpu.matmul %160, %6, %cst_44 {dimension_numbers = #tpu.dot_dimension_numbers<[1], [0], [0], [1], [0, 0, 1, 1], [], []>} : vector<8x128xbf16>, vector<128x128xbf16>, vector<8x128xf32> -> vector<8x128xf32>
    %162 = arith.addf %62, %161 : vector<8x128xf32>
    %163 = arith.negf %162 : vector<8x128xf32>
    %164 = math.exp %163 : vector<8x128xf32>
    %cst_45 = arith.constant 1.000000e+00 : f32
    %165 = vector.broadcast %cst_45 : f32 to vector<8x128xf32>
    %166 = arith.addf %165, %164 : vector<8x128xf32>
    %167 = arith.divf %165, %166 : vector<8x128xf32>
    %168 = arith.mulf %167, %31 : vector<8x128xf32>
    %169 = arith.addf %168, %34 : vector<8x128xf32>
    %c32_i32_46 = arith.constant 32 : i32
    %170 = tpu.dynamic_rotate %169 by %c32_i32_46 dim 1 : vector<8x128xf32>, i32 -> vector<8x128xf32>
    %c64_i32_47 = arith.constant 64 : i32
    %171 = tpu.dynamic_rotate %169 by %c64_i32_47 dim 1 : vector<8x128xf32>, i32 -> vector<8x128xf32>
    %c96_i32_48 = arith.constant 96 : i32
    %172 = tpu.dynamic_rotate %169 by %c96_i32_48 dim 1 : vector<8x128xf32>, i32 -> vector<8x128xf32>
    %173 = arith.mulf %169, %159 : vector<8x128xf32>
    %174 = arith.mulf %170, %172 : vector<8x128xf32>
    %175 = arith.addf %173, %174 : vector<8x128xf32>
    %176 = math.tanh %175 : vector<8x128xf32>
    %177 = arith.mulf %171, %176 : vector<8x128xf32>
    %178 = arith.select %92, %177, %158 : vector<8x128xi1>, vector<8x128xf32>
    %179 = arith.select %92, %175, %159 : vector<8x128xi1>, vector<8x128xf32>
    %180 = arith.truncf %178 : vector<8x128xf32> to vector<8x128xbf16>
    %cst_49 = arith.constant dense<0.000000e+00> : vector<8x128xf32>
    %181 = tpu.matmul %180, %6, %cst_49 {dimension_numbers = #tpu.dot_dimension_numbers<[1], [0], [0], [1], [0, 0, 1, 1], [], []>} : vector<8x128xbf16>, vector<128x128xbf16>, vector<8x128xf32> -> vector<8x128xf32>
    %182 = arith.addf %65, %181 : vector<8x128xf32>
    %183 = arith.negf %182 : vector<8x128xf32>
    %184 = math.exp %183 : vector<8x128xf32>
    %cst_50 = arith.constant 1.000000e+00 : f32
    %185 = vector.broadcast %cst_50 : f32 to vector<8x128xf32>
    %186 = arith.addf %185, %184 : vector<8x128xf32>
    %187 = arith.divf %185, %186 : vector<8x128xf32>
    %188 = arith.mulf %187, %31 : vector<8x128xf32>
    %189 = arith.addf %188, %34 : vector<8x128xf32>
    %c32_i32_51 = arith.constant 32 : i32
    %190 = tpu.dynamic_rotate %189 by %c32_i32_51 dim 1 : vector<8x128xf32>, i32 -> vector<8x128xf32>
    %c64_i32_52 = arith.constant 64 : i32
    %191 = tpu.dynamic_rotate %189 by %c64_i32_52 dim 1 : vector<8x128xf32>, i32 -> vector<8x128xf32>
    %c96_i32_53 = arith.constant 96 : i32
    %192 = tpu.dynamic_rotate %189 by %c96_i32_53 dim 1 : vector<8x128xf32>, i32 -> vector<8x128xf32>
    %193 = arith.mulf %189, %179 : vector<8x128xf32>
    %194 = arith.mulf %190, %192 : vector<8x128xf32>
    %195 = arith.addf %193, %194 : vector<8x128xf32>
    %196 = math.tanh %195 : vector<8x128xf32>
    %197 = arith.mulf %191, %196 : vector<8x128xf32>
    %198 = arith.select %97, %197, %178 : vector<8x128xi1>, vector<8x128xf32>
    %199 = arith.select %97, %195, %179 : vector<8x128xi1>, vector<8x128xf32>
    %200 = arith.truncf %198 : vector<8x128xf32> to vector<8x128xbf16>
    %cst_54 = arith.constant dense<0.000000e+00> : vector<8x128xf32>
    %201 = tpu.matmul %200, %6, %cst_54 {dimension_numbers = #tpu.dot_dimension_numbers<[1], [0], [0], [1], [0, 0, 1, 1], [], []>} : vector<8x128xbf16>, vector<128x128xbf16>, vector<8x128xf32> -> vector<8x128xf32>
    %202 = arith.addf %68, %201 : vector<8x128xf32>
    %203 = arith.negf %202 : vector<8x128xf32>
    %204 = math.exp %203 : vector<8x128xf32>
    %cst_55 = arith.constant 1.000000e+00 : f32
    %205 = vector.broadcast %cst_55 : f32 to vector<8x128xf32>
    %206 = arith.addf %205, %204 : vector<8x128xf32>
    %207 = arith.divf %205, %206 : vector<8x128xf32>
    %208 = arith.mulf %207, %31 : vector<8x128xf32>
    %209 = arith.addf %208, %34 : vector<8x128xf32>
    %c32_i32_56 = arith.constant 32 : i32
    %210 = tpu.dynamic_rotate %209 by %c32_i32_56 dim 1 : vector<8x128xf32>, i32 -> vector<8x128xf32>
    %c64_i32_57 = arith.constant 64 : i32
    %211 = tpu.dynamic_rotate %209 by %c64_i32_57 dim 1 : vector<8x128xf32>, i32 -> vector<8x128xf32>
    %c96_i32_58 = arith.constant 96 : i32
    %212 = tpu.dynamic_rotate %209 by %c96_i32_58 dim 1 : vector<8x128xf32>, i32 -> vector<8x128xf32>
    %213 = arith.mulf %209, %199 : vector<8x128xf32>
    %214 = arith.mulf %210, %212 : vector<8x128xf32>
    %215 = arith.addf %213, %214 : vector<8x128xf32>
    %216 = math.tanh %215 : vector<8x128xf32>
    %217 = arith.mulf %211, %216 : vector<8x128xf32>
    %218 = arith.select %102, %217, %198 : vector<8x128xi1>, vector<8x128xf32>
    %219 = arith.select %102, %215, %199 : vector<8x128xi1>, vector<8x128xf32>
    %220 = arith.truncf %218 : vector<8x128xf32> to vector<8x128xbf16>
    %cst_59 = arith.constant dense<0.000000e+00> : vector<8x128xf32>
    %221 = tpu.matmul %220, %6, %cst_59 {dimension_numbers = #tpu.dot_dimension_numbers<[1], [0], [0], [1], [0, 0, 1, 1], [], []>} : vector<8x128xbf16>, vector<128x128xbf16>, vector<8x128xf32> -> vector<8x128xf32>
    %222 = arith.addf %71, %221 : vector<8x128xf32>
    %223 = arith.negf %222 : vector<8x128xf32>
    %224 = math.exp %223 : vector<8x128xf32>
    %cst_60 = arith.constant 1.000000e+00 : f32
    %225 = vector.broadcast %cst_60 : f32 to vector<8x128xf32>
    %226 = arith.addf %225, %224 : vector<8x128xf32>
    %227 = arith.divf %225, %226 : vector<8x128xf32>
    %228 = arith.mulf %227, %31 : vector<8x128xf32>
    %229 = arith.addf %228, %34 : vector<8x128xf32>
    %c32_i32_61 = arith.constant 32 : i32
    %230 = tpu.dynamic_rotate %229 by %c32_i32_61 dim 1 : vector<8x128xf32>, i32 -> vector<8x128xf32>
    %c64_i32_62 = arith.constant 64 : i32
    %231 = tpu.dynamic_rotate %229 by %c64_i32_62 dim 1 : vector<8x128xf32>, i32 -> vector<8x128xf32>
    %c96_i32_63 = arith.constant 96 : i32
    %232 = tpu.dynamic_rotate %229 by %c96_i32_63 dim 1 : vector<8x128xf32>, i32 -> vector<8x128xf32>
    %233 = arith.mulf %229, %219 : vector<8x128xf32>
    %234 = arith.mulf %230, %232 : vector<8x128xf32>
    %235 = arith.addf %233, %234 : vector<8x128xf32>
    %236 = math.tanh %235 : vector<8x128xf32>
    %237 = arith.mulf %231, %236 : vector<8x128xf32>
    %238 = arith.select %107, %237, %218 : vector<8x128xi1>, vector<8x128xf32>
    %239 = arith.select %107, %235, %219 : vector<8x128xi1>, vector<8x128xf32>
    %240 = arith.truncf %238 : vector<8x128xf32> to vector<8x128xbf16>
    %cst_64 = arith.constant dense<0.000000e+00> : vector<8x128xf32>
    %241 = tpu.matmul %240, %6, %cst_64 {dimension_numbers = #tpu.dot_dimension_numbers<[1], [0], [0], [1], [0, 0, 1, 1], [], []>} : vector<8x128xbf16>, vector<128x128xbf16>, vector<8x128xf32> -> vector<8x128xf32>
    %242 = arith.addf %74, %241 : vector<8x128xf32>
    %243 = arith.negf %242 : vector<8x128xf32>
    %244 = math.exp %243 : vector<8x128xf32>
    %cst_65 = arith.constant 1.000000e+00 : f32
    %245 = vector.broadcast %cst_65 : f32 to vector<8x128xf32>
    %246 = arith.addf %245, %244 : vector<8x128xf32>
    %247 = arith.divf %245, %246 : vector<8x128xf32>
    %248 = arith.mulf %247, %31 : vector<8x128xf32>
    %249 = arith.addf %248, %34 : vector<8x128xf32>
    %c32_i32_66 = arith.constant 32 : i32
    %250 = tpu.dynamic_rotate %249 by %c32_i32_66 dim 1 : vector<8x128xf32>, i32 -> vector<8x128xf32>
    %c64_i32_67 = arith.constant 64 : i32
    %251 = tpu.dynamic_rotate %249 by %c64_i32_67 dim 1 : vector<8x128xf32>, i32 -> vector<8x128xf32>
    %c96_i32_68 = arith.constant 96 : i32
    %252 = tpu.dynamic_rotate %249 by %c96_i32_68 dim 1 : vector<8x128xf32>, i32 -> vector<8x128xf32>
    %253 = arith.mulf %249, %239 : vector<8x128xf32>
    %254 = arith.mulf %250, %252 : vector<8x128xf32>
    %255 = arith.addf %253, %254 : vector<8x128xf32>
    %256 = math.tanh %255 : vector<8x128xf32>
    %257 = arith.mulf %251, %256 : vector<8x128xf32>
    %258 = arith.select %112, %257, %238 : vector<8x128xi1>, vector<8x128xf32>
    %259 = arith.select %112, %255, %239 : vector<8x128xi1>, vector<8x128xf32>
    %260 = arith.truncf %258 : vector<8x128xf32> to vector<8x128xbf16>
    %cst_69 = arith.constant dense<0.000000e+00> : vector<8x128xf32>
    %261 = tpu.matmul %260, %6, %cst_69 {dimension_numbers = #tpu.dot_dimension_numbers<[1], [0], [0], [1], [0, 0, 1, 1], [], []>} : vector<8x128xbf16>, vector<128x128xbf16>, vector<8x128xf32> -> vector<8x128xf32>
    %262 = arith.addf %77, %261 : vector<8x128xf32>
    %263 = arith.negf %262 : vector<8x128xf32>
    %264 = math.exp %263 : vector<8x128xf32>
    %cst_70 = arith.constant 1.000000e+00 : f32
    %265 = vector.broadcast %cst_70 : f32 to vector<8x128xf32>
    %266 = arith.addf %265, %264 : vector<8x128xf32>
    %267 = arith.divf %265, %266 : vector<8x128xf32>
    %268 = arith.mulf %267, %31 : vector<8x128xf32>
    %269 = arith.addf %268, %34 : vector<8x128xf32>
    %c32_i32_71 = arith.constant 32 : i32
    %270 = tpu.dynamic_rotate %269 by %c32_i32_71 dim 1 : vector<8x128xf32>, i32 -> vector<8x128xf32>
    %c64_i32_72 = arith.constant 64 : i32
    %271 = tpu.dynamic_rotate %269 by %c64_i32_72 dim 1 : vector<8x128xf32>, i32 -> vector<8x128xf32>
    %c96_i32_73 = arith.constant 96 : i32
    %272 = tpu.dynamic_rotate %269 by %c96_i32_73 dim 1 : vector<8x128xf32>, i32 -> vector<8x128xf32>
    %273 = arith.mulf %269, %259 : vector<8x128xf32>
    %274 = arith.mulf %270, %272 : vector<8x128xf32>
    %275 = arith.addf %273, %274 : vector<8x128xf32>
    %276 = math.tanh %275 : vector<8x128xf32>
    %277 = arith.mulf %271, %276 : vector<8x128xf32>
    %278 = arith.select %117, %277, %258 : vector<8x128xi1>, vector<8x128xf32>
    %279 = arith.truncf %278 : vector<8x128xf32> to vector<8x128xbf16>
    %c0_74 = arith.constant 0 : index
    %c0_75 = arith.constant 0 : index
    %280 = vector.load %arg5[%c0_74, %c0_75] : memref<128x128xbf16, #tpu.memory_space<vmem>>, vector<128x128xbf16>
    %cst_76 = arith.constant dense<0.000000e+00> : vector<8x128xf32>
    %281 = tpu.matmul %279, %280, %cst_76 {dimension_numbers = #tpu.dot_dimension_numbers<[1], [0], [0], [1], [0, 0, 1, 1], [], []>} : vector<8x128xbf16>, vector<128x128xbf16>, vector<8x128xf32> -> vector<8x128xf32>
    %c0_77 = arith.constant 0 : index
    %c0_78 = arith.constant 0 : index
    %282 = vector.load %arg6[%c0_77, %c0_78] : memref<1x128xf32, #tpu.memory_space<vmem>>, vector<1x128xf32>
    %283 = vector.broadcast %282 : vector<1x128xf32> to vector<8x128xf32>
    %284 = arith.addf %281, %283 : vector<8x128xf32>
    %c0_79 = arith.constant 0 : index
    %c0_80 = arith.constant 0 : index
    %285 = vector.load %arg7[%c0_79, %c0_80] : memref<8x128xf32, #tpu.memory_space<vmem>>, vector<8x128xf32>
    tpu.vector_store %arg7[%c0_79, %c0_80], %284 {strides = array<i32>} : memref<8x128xf32, #tpu.memory_space<vmem>>, vector<8x128xf32>,
    return
  }
}

</mosaic_0001>

<bundles_post_ra>
// kernel: tpu_custom_call.1
= control target key start
LH: loop header
LB: loop body
LE: loop exit
PB: predicated region body
PF: predicated region fallthrough
CT: control target
= control target key end

     0   :  { %12 = vsyncpa [#allocation3], 0  ;;  %s1892_s0 = inlined_call_operand.vmem [shape: bf16[64,32], index: 0, kind: input, shape index: {}]   ;;  %s1893_s1 = inlined_call_operand.vmem [shape: s32[8,1], index: 1, kind: input, shape index: {}]   ;;  %s1894_s2 = inlined_call_operand.hbm [shape: bf16[32,128], index: 2, kind: input, shape index: {}]   ;;  %s1895_s3 = inlined_call_operand.vmem [shape: bf16[128,128], index: 3, kind: input, shape index: {}]   ;;  %s1896_s4 = inlined_call_operand.vmem [shape: f32[1,128], index: 4, kind: input, shape index: {}]   ;;  %s1897_s5 = inlined_call_operand.hbm [shape: bf16[128,128], index: 5, kind: input, shape index: {}]   ;;  %s1898_s6 = inlined_call_operand.vmem [shape: f32[1,128], index: 6, kind: input, shape index: {}]   ;;  %s1899_s7 = inlined_call_operand.hbm [shape: f32[8,128], index: 7, kind: output, shape index: {}]  }
   0x1   :  { %13 = vsyncpa [#allocation6], 0 }
   0x2   :  { %14 = vsyncpa [#allocation4], 0  ;;  %s1406_s24 = smov [#allocation2]   ;;  %s1334_s28 = scalar_lea.hbm %s1894_s2, 256 }
   0x3   :  { %s24_s25 = sshll.u32 %s1406_s24, 4  ;;  %p1335_p0 = scmp.ne.s32.totalorder %s1894_s2, %s1334_s28  ;;  %s25_s25 = int_to_ptr.vmem [resolvable:$true] %s24_s25 }
   0x4   :  { %p1338_p1 = scmp.lt.u32.totalorder %s1334_s28, %s1894_s2 }
   0x6   :  { %p1340_p2 = pnand %p1338_p1, %p1335_p0 }
   0x8   :  { %1343 = shalt.err (!%p1340_p2)
}
   0x9   :  { %s1344_s10 = scalar_lea.vmem %s25_s25, 256  ;;  %p1349_p4 = scmp.lt.s32.totalorder %s25_s25, %s25_s25 }
   0xa   :  { %p1345_p3 = scmp.ne.s32.totalorder %s25_s25, %s1344_s10  ;;  %p1350_p5 = scmp.lt.s32.totalorder %s1344_s10, %s1344_s10 }
   0xc   :  { %p1351_p6 = por %p1350_p5, %p1349_p4 }
   0xe   :  { %p1352_p7 = pnand %p1351_p6, %p1345_p3 }
  0x10   :  { %1355 = shalt.err (!%p1352_p7)
}
  0x11   :  { %s1407_s11 = smov 64   ;;  %s1408_s12 = smov 4  }
  0x12   :  { %30 = dma.hbm_to_vmem [thread:$0]  %s1894_s2, 256, %s25_s25, [#allocation3], %s1407_s11, %s1407_s11, %s1408_s12  }
  0x13   :  { %s1409_s15 = smov [#allocation5]   ;;  %s1356_s19 = scalar_lea.hbm %s1897_s5, 1024 }
  0x14   :  { %s40_s16 = sshll.u32 %s1409_s15, 4  ;;  %p1357_p8 = scmp.ne.s32.totalorder %s1897_s5, %s1356_s19  ;;  %s41_s16 = int_to_ptr.vmem [resolvable:$true] %s40_s16 }
  0x15   :  { %p1360_p9 = scmp.lt.u32.totalorder %s1356_s19, %s1897_s5 }
  0x17   :  { %p1362_p10 = pnand %p1360_p9, %p1357_p8 }
  0x19   :  { %1365 = shalt.err (!%p1362_p10)
}
  0x1a   :  { %s1366_s24 = scalar_lea.vmem %s41_s16, 1024  ;;  %p1371_p12 = scmp.lt.s32.totalorder %s41_s16, %s41_s16 }
  0x1b   :  { %p1367_p11 = scmp.ne.s32.totalorder %s41_s16, %s1366_s24  ;;  %p1372_p13 = scmp.lt.s32.totalorder %s1366_s24, %s1366_s24 }
  0x1d   :  { %p1373_p0 = por %p1372_p13, %p1371_p12 }
  0x1f   :  { %p1374_p1 = pnand %p1373_p0, %p1367_p11 }
  0x21   :  { %1377 = shalt.err (!%p1374_p1)
}
  0x22   :  { %46 = dma.hbm_to_vmem [thread:$0]  %s1897_s5, 1024, %s41_s16, [#allocation6], %s1407_s11, %s1407_s11, %s1408_s12  }
  0x23   :  { %1400 = dma.done.wait [#allocation3], 256  }
  0x24   :  { %1401 = vsyncadd [#allocation3], 4294967040 }
  0x25   :  { %1402 = dma.done.wait [#allocation6], 1024  }
  0x26   :  { %1403 = vsyncadd [#allocation6], 4294966272  ;;  %v1410_v0 = vmov 0.0   ;;  %vm1411_vm0 = vmmov 0   ;;  %v1412_v1 = vmov 0   ;;  %v1264_v2 = vld [vmem:[#allocation2] sm:$0xff]   ;;  %v202_v17 = vlaneseq }
  0x27   :  { %1064 = vmatprep.subr.bf16.mxu1 %v1410_v0  ;;  %1080 = vmatprep.mubr.msk.bf16.mxu1 %vm1411_vm0, %v1410_v0  ;;  %v1500_v3 = vld [vmem:[%s1895_s3] sm:$0xff]   ;;  %v1266_v4 = vld [vmem:[#allocation2 + $0x8] sm:$0xff]   ;;  %vm107_vm1 = vcmask 261120   ;;  %v1520_v8 = vld [vmem:[%s1895_s3 + $0x10] sm:$0xff]   ;;  %v1413_v54 = vmov 1.0   ;;  %s1423_s28 = smov [#allocation7]  }
  0x28   :  { %1262 = vset.pattern.permute.xlu1 %v1412_v1  ;;  %1263 = vset.pattern.permute.xlu0 %v1412_v1  ;;  %v1506_v5 = vld [vmem:[%s1895_s3 + $0x8] sm:$0xff]   ;;  %v1268_v6 = vld [vmem:[%s1892_s0] sm:$0xff]   ;;  %v1272_v9 = vld [vmem:[%s1892_s0 + $0x10] sm:$0xff]   ;;  %v203_v19 = vand.u32 127, %v202_v17  ;;  %s916_s29 = sshll.u32 %s1423_s28, 4  ;;  %s917_s29 = int_to_ptr.vmem [resolvable:$true] %s916_s29 }
  0x29   :  { %1052 = vmatprep.subr.bf16.mxu0 %v1264_v2  ;;  %1065 = vmatpush3.bf16.msra.mxu1 %v1500_v3  ;;  %v1269_v7 = vld [vmem:[%s1892_s0 + $0x8] sm:$0xff]   ;;  %v1532_v10 = vld [vmem:[%s1895_s3 + $0x18] sm:$0xff]   ;;  %v1543_v12 = vld [vmem:[%s1895_s3 + $0x20] sm:$0xff]   ;;  %s1378_s30 = scalar_lea.vmem %s917_s29, 128  ;;  %p1383_p3 = scmp.lt.s32.totalorder %s917_s29, %s917_s29 }
  0x2a   :  { %1053 = vmatpush3.bf16.msra.mxu0 %v1264_v2  ;;  %1066 = vmatprep.subr.bf16.mxu1 %v1410_v0  ;;  %v1273_v11 = vld [vmem:[%s1892_s0 + $0x18] sm:$0xff]   ;;  %v1555_v13 = vld [vmem:[%s1895_s3 + $0x28] sm:$0xff]   ;;  %v1566_v14 = vld [vmem:[%s1895_s3 + $0x30] sm:$0xff]   ;;  %v208_v26 = vand.u32 31, %v203_v19  ;;  %vm217_vm3 = vcmp.ge.s32.totalorder %v203_v19, 96  ;;  %p1379_p2 = scmp.ne.s32.totalorder %s917_s29, %s1378_s30  ;;  %p1384_p4 = scmp.lt.s32.totalorder %s1378_s30, %s1378_s30 }
  0x2b   :  { %1054 = vmatprep.subr.bf16.mxu0 %v1266_v4  ;;  %1056 = vmatprep.mubr.msk.bf16.mxu0 %vm107_vm1, %v1268_v6  ;;  %v1575_v15 = vld [vmem:[%s1895_s3 + $0x38] sm:$0xff]   ;;  %v201_v16 = vld [vmem:[%s1893_s1] sm:$0xff]  ;;  %v1665_v55 = vsel %vm217_vm3, 2.0, %v1413_v54  ;;  %v1668_v57 = vsel %vm217_vm3, -1.0, %v1410_v0  ;;  %s1414_s1 = smov 32  }
  0x2c   :  { %230 = vperm.xlu1 %1262, %v201_v16   ;;  %v926_v18 = vld [vmem:[%s1896_s4] ss:$0 sm:$0xff]  ;;  %vm1619_vm2 = vcmp.lt.s32.totalorder %v208_v26, 16  ;;  %s1415_s4 = smov 96   ;;  %p1385_p5 = por %p1384_p4, %p1383_p3 }
  0x2d   :  { %1067 = vmatpush3.bf16.msra.mxu1 %v1506_v5 }
  0x2e   :  { %1055 = vmatpush3.bf16.msra.mxu0 %v1266_v4  ;;  %1068 = vmatprep.subr.bf16.mxu1 %v1410_v0  ;;  %p1386_p6 = pnand %p1385_p5, %p1379_p2 }
  0x2f   :  { %1084 = vmatprep.subr.bf16.mxu0 %v1410_v0 }
  0x31   :  { %1057 = vmatmul.mubr.msk.bf16.vlgmr.msra.gmra.mrb[0].mxu0 %vm107_vm1, %v1269_v7  ;;  %1069 = vmatpush3.bf16.msra.mxu1 %v1520_v8 }
  0x32   :  { %1060 = vmatprep.mubr.msk.bf16.mxu0 %vm107_vm1, %v1272_v9  ;;  %1070 = vmatprep.subr.bf16.mxu1 %v1410_v0  ;;  %v1416_v9 = vmov 7  }
  0x33   :  { %1085 = vmatpush3.bf16.msra.mxu0 %v1500_v3 }
  0x34   :  { %1086 = vmatprep.subr.bf16.mxu0 %v1410_v0 }
  0x35   :  { %1071 = vmatpush3.bf16.msra.mxu1 %v1532_v10 }
  0x36   :  { %1072 = vmatprep.subr.bf16.mxu1 %v1410_v0 }
  0x37   :  { %1087 = vmatpush3.bf16.msra.mxu0 %v1506_v5 }
  0x38   :  { %1088 = vmatprep.subr.bf16.mxu0 %v1410_v0 }
  0x39   :  { %1061 = vmatmul.mubr.msk.bf16.gmra.mrb[4].mxu0 %vm107_vm1, %v1273_v11  ;;  %1073 = vmatpush3.bf16.msra.mxu1 %v1543_v12  ;;  %v228_v11 = vsel %vm1619_vm2, 0, %v1416_v9 }
  0x3a   :  { %1100 = vmatprep.mubr.msk.bf16.mxu0 %vm1411_vm0, %v1410_v0  ;;  %1074 = vmatprep.subr.bf16.mxu1 %v1410_v0 }
  0x3b   :  { %1089 = vmatpush3.bf16.msra.mxu0 %v1520_v8 }
  0x3c   :  { %1090 = vmatprep.subr.bf16.mxu0 %v1410_v0 }
  0x3d   :  { %1075 = vmatpush3.bf16.msra.mxu1 %v1555_v13 }
  0x3e   :  { %1076 = vmatprep.subr.bf16.mxu1 %v1410_v0 }
  0x3f   :  { %1091 = vmatpush3.bf16.msra.mxu0 %v1532_v10 }
  0x40   :  { %1092 = vmatprep.subr.bf16.mxu0 %v1410_v0 }
  0x41   :  { %1077 = vmatpush3.bf16.msra.mxu1 %v1566_v14 }
  0x42   :  { %1078 = vmatprep.subr.bf16.mxu1 %v1410_v0 }
  0x43   :  { %1093 = vmatpush3.bf16.msra.mxu0 %v1543_v12 }
  0x44   :  { %1094 = vmatprep.subr.bf16.mxu0 %v1410_v0 }
  0x45   :  { %1079 = vmatpush3.bf16.msra.mxu1 %v1575_v15 }
  0x46   :  { %1104 = vmatprep.subr.bf16.mxu1 %v1410_v0 }
  0x47   :  { %1095 = vmatpush3.bf16.msra.mxu0 %v1555_v13 }
  0x48   :  { %1096 = vmatprep.subr.bf16.mxu0 %v1410_v0  ;;  %1081 = vmatmul.mubr.bf16.vlgmr.msra.gmra.mrb[0].mxu1 %v1412_v1 }
  0x49   :  { %1105 = vmatpush3.bf16.msra.mxu1 %v1500_v3  ;;  %1120 = vmatprep.mubr.msk.bf16.mxu1 %vm1411_vm0, %v1410_v0 }
  0x4a   :  { %1106 = vmatprep.subr.bf16.mxu1 %v1410_v0 }
  0x4b   :  { %1097 = vmatpush3.bf16.msra.mxu0 %v1566_v14 }
  0x4c   :  { %1098 = vmatprep.subr.bf16.mxu0 %v1410_v0 }
  0x4d   :  { %1107 = vmatpush3.bf16.msra.mxu1 %v1506_v5 }
  0x4e   :  { %1108 = vmatprep.subr.bf16.mxu1 %v1410_v0 }
  0x4f   :  { %1099 = vmatpush3.bf16.msra.mxu0 %v1575_v15 }
  0x50   :  { %1124 = vmatprep.subr.bf16.mxu0 %v1410_v0 }
  0x51   :  { %1109 = vmatpush3.bf16.msra.mxu1 %v1520_v8 }
  0x52   :  { %1110 = vmatprep.subr.bf16.mxu1 %v1410_v0 }
  0x55   :  { %1111 = vmatpush3.bf16.msra.mxu1 %v1532_v10 }
  0x56   :  { %1112 = vmatprep.subr.bf16.mxu1 %v1410_v0 }
  0x59   :  { %1113 = vmatpush3.bf16.msra.mxu1 %v1543_v12 }
  0x5a   :  { %1114 = vmatprep.subr.bf16.mxu1 %v1410_v0 }
  0x5d   :  { %1115 = vmatpush3.bf16.msra.mxu1 %v1555_v13 }
  0x5e   :  { %1116 = vmatprep.subr.bf16.mxu1 %v1410_v0 }
  0x61   :  { %1117 = vmatpush3.bf16.msra.mxu1 %v1566_v14 }
  0x62   :  { %1118 = vmatprep.subr.bf16.mxu1 %v1410_v0 }
  0x65   :  { %1119 = vmatpush3.bf16.msra.mxu1 %v1575_v15 }
  0x66   :  { %1144 = vmatprep.subr.bf16.mxu1 %v1410_v0 }
  0xab   :  { %v1675_v4 = vpop.permute.xlu1 %230 }
  0xac   :  { %vm232_vm4 = vcmp.lt.s32.totalorder %v228_v11, %v1675_v4 }
  0xad   :  { %vm946_vm5 = vmpackc.low %vm232_vm4, %vm232_vm4 }
 0x104   :  { %v1058_v20 = vpop.f32.mrb[0].mxu0 }
 0x105   :  { %v1613_v21 = vadd.f32 %v1058_v20, %v926_v18  ;;  %v154_v22 = vpop.f32.mrb[1].mxu0 }
 0x106   :  { %v1059_v23 = vpop.f32.mrb[2].mxu0  ;;  %v1623_v30 = vadd.f32 %v926_v18, %v154_v22 }
 0x107   :  { %v1615_v24 = vadd.f32 %v1059_v23, %v926_v18  ;;  %v157_v25 = vpop.f32.mrb[3].mxu0 }
 0x108   :  { %v1617_v27 = vadd.f32 %v926_v18, %v157_v25 }
 0x10c   :  { %v1062_v29 = vpop.f32.mrb[4].mxu0 }
 0x10d   :  { %v1625_v31 = vadd.f32 %v1062_v29, %v926_v18  ;;  %v170_v32 = vpop.f32.mrb[5].mxu0 }
 0x10e   :  { %v1627_v33 = vadd.f32 %v926_v18, %v170_v32  ;;  %v1063_v34 = vpop.f32.mrb[6].mxu0 }
 0x10f   :  { %v1629_v35 = vadd.f32 %v1063_v34, %v926_v18  ;;  %v173_v36 = vpop.f32.mrb[7].mxu0  ;;  %v221_v37 = vsel %vm1619_vm2, %v1617_v27, %v1625_v31  ;;  %v226_v38 = vsel %vm1619_vm2, %v1625_v31, %v1617_v27 }
 0x110   :  { %v1639_v39 = vadd.f32 %v926_v18, %v173_v36  ;;  %v223_v40 = vsel %vm1619_vm2, %v1615_v24, %v1627_v33  ;;  %v224_v41 = vsel %vm1619_vm2, %v1627_v33, %v1615_v24 }
 0x111   :  { %v220_v42 = vsel %vm1619_vm2, %v1623_v30, %v1629_v35  ;;  %v227_v43 = vsel %vm1619_vm2, %v1629_v35, %v1623_v30 }
 0x112   :  { %v222_v44 = vsel %vm1619_vm2, %v1613_v21, %v1639_v39  ;;  %v225_v45 = vsel %vm1619_vm2, %v1639_v39, %v1613_v21 }
 0x11b   :  { %v329_v46 = vpop.f32.mrb[0].mxu1 }
 0x11c   :  { %v335_v47 = vadd.f32 %v329_v46, %v220_v42  ;;  %v1082_v48 = vpop.f32.mrb[1].mxu1 }
 0x11d   :  { %v332_v49 = vpop.f32.mrb[2].mxu1 }
 0x11e   :  { %v945_v50 = vmul.f32 -1.442695, %v335_v47  ;;  %v1083_v51 = vpop.f32.mrb[3].mxu1  ;;  %v1417_v49 = vmov 6  }
 0x120   :  { %1286 = vpow2.f32 %v945_v50  ;;  %v233_v50 = vsel %vm1619_vm2, 1, %v1417_v49 }
 0x121   :  { %vm234_vm6 = vcmp.lt.s32.totalorder %v233_v50, %v1675_v4 }
 0x12a   :  { %v1287_v52 = vpop.eup %1286 }
 0x12b   :  { %v339_v53 = vadd.f32 1.0, %v1287_v52 }
 0x12d   :  { %1288 = vrcp.f32 %v339_v53 }
 0x137   :  { %v1289_v56 = vpop.eup %1288 }
 0x138   :  { %v342_v58 = vmul.f32 %v1289_v56, %v1665_v55 }
 0x13a   :  { %v343_v59 = vadd.f32 %v342_v58, %v1668_v57 }
 0x13c   :  { %346 = vrot.lane.b32.xlu1 %v343_v59, %s1407_s11  ;;  %344 = vrot.lane.b32.xlu0 %v343_v59, %s1414_s1  ;;  %v350_v62 = vmul.f32 0.0, %v343_v59 }
 0x140   :  { %348 = vrot.lane.b32.xlu0 %v343_v59, %s1415_s4 }
 0x1ae   :  { %v345_v60 = vpop.permute.xlu0 %344  ;;  %v347_v7 = vpop.permute.xlu1 %346 }
 0x1b2   :  { %v349_v61 = vpop.permute.xlu0 %348 }
 0x1b3   :  { %v351_v63 = vmul.f32 %v349_v61, %v345_v60 }
 0x1b5   :  { %v352_v2 = vadd.f32 %v351_v63, %v350_v62 }
 0x1b7   :  { %1290 = vtanh.f32 %v352_v2 }
 0x1c1   :  { %v1291_v6 = vpop.eup %1290 }
 0x1c2   :  { %v354_v16 = vmul.f32 %v1291_v6, %v347_v7 }
 0x1c4   :  { %v947_v17 = vpack.c.bf16 %v354_v16, %v354_v16  ;;  %v355_v58 = vsel %vm232_vm4, %v354_v16, 0.0 }
 0x1c6   :  { %1101 = vmatmul.mubr.msk.bf16.vlgmr.msra.gmra.mrb[8].mxu0 %vm946_vm5, %v947_v17 }
 0x1c7   :  { %1125 = vmatpush3.bf16.msra.mxu0 %v1500_v3  ;;  %1140 = vmatprep.mubr.msk.bf16.mxu0 %vm1411_vm0, %v1410_v0 }
 0x1c8   :  { %1126 = vmatprep.subr.bf16.mxu0 %v1410_v0 }
 0x1cb   :  { %1127 = vmatpush3.bf16.msra.mxu0 %v1506_v5 }
 0x1cc   :  { %1128 = vmatprep.subr.bf16.mxu0 %v1410_v0 }
 0x1cf   :  { %1129 = vmatpush3.bf16.msra.mxu0 %v1520_v8 }
 0x1d0   :  { %1130 = vmatprep.subr.bf16.mxu0 %v1410_v0 }
 0x1d3   :  { %1131 = vmatpush3.bf16.msra.mxu0 %v1532_v10 }
 0x1d4   :  { %1132 = vmatprep.subr.bf16.mxu0 %v1410_v0 }
 0x1d7   :  { %1133 = vmatpush3.bf16.msra.mxu0 %v1543_v12 }
 0x1d8   :  { %1134 = vmatprep.subr.bf16.mxu0 %v1410_v0 }
 0x1db   :  { %1135 = vmatpush3.bf16.msra.mxu0 %v1555_v13 }
 0x1dc   :  { %1136 = vmatprep.subr.bf16.mxu0 %v1410_v0 }
 0x1df   :  { %1137 = vmatpush3.bf16.msra.mxu0 %v1566_v14 }
 0x1e0   :  { %1138 = vmatprep.subr.bf16.mxu0 %v1410_v0 }
 0x1e3   :  { %1139 = vmatpush3.bf16.msra.mxu0 %v1575_v15 }
 0x1e4   :  { %1164 = vmatprep.subr.bf16.mxu0 %v1410_v0 }
 0x299   :  { %v392_v18 = vpop.f32.mrb[8].mxu0 }
 0x29a   :  { %v398_v19 = vadd.f32 %v392_v18, %v221_v37  ;;  %v1102_v20 = vpop.f32.mrb[9].mxu0  ;;  %v356_v37 = vsel %vm232_vm4, %v352_v2, 0.0 }
 0x29b   :  { %v395_v22 = vpop.f32.mrb[10].mxu0 }
 0x29c   :  { %v949_v23 = vmul.f32 -1.442695, %v398_v19  ;;  %v1103_v25 = vpop.f32.mrb[11].mxu0 }
 0x29e   :  { %1292 = vpow2.f32 %v949_v23  ;;  %v1418_v23 = vmov 5  }
 0x29f   :  { %v235_v25 = vsel %vm1619_vm2, 2, %v1418_v23 }
 0x2a0   :  { %vm236_vm7 = vcmp.lt.s32.totalorder %v235_v25, %v1675_v4 }
 0x2a8   :  { %v1293_v26 = vpop.eup %1292 }
 0x2a9   :  { %v402_v29 = vadd.f32 1.0, %v1293_v26 }
 0x2ab   :  { %1294 = vrcp.f32 %v402_v29 }
 0x2b5   :  { %v1295_v32 = vpop.eup %1294 }
 0x2b6   :  { %v405_v34 = vmul.f32 %v1295_v32, %v1665_v55 }
 0x2b8   :  { %v406_v36 = vadd.f32 %v405_v34, %v1668_v57 }
 0x2ba   :  { %411 = vrot.lane.b32.xlu1 %v406_v36, %s1415_s4  ;;  %407 = vrot.lane.b32.xlu0 %v406_v36, %s1414_s1  ;;  %v413_v47 = vmul.f32 %v406_v36, %v356_v37 }
 0x2be   :  { %409 = vrot.lane.b32.xlu0 %v406_v36, %s1407_s11 }
 0x32c   :  { %v412_v42 = vpop.permute.xlu1 %411  ;;  %v408_v46 = vpop.permute.xlu0 %407 }
 0x32d   :  { %v414_v48 = vmul.f32 %v412_v42, %v408_v46 }
 0x32f   :  { %v415_v51 = vadd.f32 %v414_v48, %v413_v47 }
 0x330   :  { %v410_v54 = vpop.permute.xlu0 %409 }
 0x331   :  { %1296 = vtanh.f32 %v415_v51  ;;  %v419_v52 = vsel %vm234_vm6, %v415_v51, %v356_v37 }
 0x33b   :  { %v1297_v53 = vpop.eup %1296 }
 0x33c   :  { %v417_v56 = vmul.f32 %v1297_v53, %v410_v54 }
 0x33e   :  { %v418_v59 = vsel %vm234_vm6, %v417_v56, %v355_v58 }
 0x33f   :  { %v420_v60 = vpack.c.bf16 %v418_v59, %v418_v59 }
 0x341   :  { %1121 = vmatmul.mubr.bf16.vlgmr.msra.gmra.mrb[4].mxu1 %v420_v60 }
 0x342   :  { %1145 = vmatpush3.bf16.msra.mxu1 %v1500_v3  ;;  %1160 = vmatprep.mubr.msk.bf16.mxu1 %vm1411_vm0, %v1410_v0 }
 0x343   :  { %1146 = vmatprep.subr.bf16.mxu1 %v1410_v0 }
 0x346   :  { %1147 = vmatpush3.bf16.msra.mxu1 %v1506_v5 }
 0x347   :  { %1148 = vmatprep.subr.bf16.mxu1 %v1410_v0 }
 0x34a   :  { %1149 = vmatpush3.bf16.msra.mxu1 %v1520_v8 }
 0x34b   :  { %1150 = vmatprep.subr.bf16.mxu1 %v1410_v0 }
 0x34e   :  { %1151 = vmatpush3.bf16.msra.mxu1 %v1532_v10 }
 0x34f   :  { %1152 = vmatprep.subr.bf16.mxu1 %v1410_v0 }
 0x352   :  { %1153 = vmatpush3.bf16.msra.mxu1 %v1543_v12 }
 0x353   :  { %1154 = vmatprep.subr.bf16.mxu1 %v1410_v0 }
 0x356   :  { %1155 = vmatpush3.bf16.msra.mxu1 %v1555_v13 }
 0x357   :  { %1156 = vmatprep.subr.bf16.mxu1 %v1410_v0 }
 0x35a   :  { %1157 = vmatpush3.bf16.msra.mxu1 %v1566_v14 }
 0x35b   :  { %1158 = vmatprep.subr.bf16.mxu1 %v1410_v0 }
 0x35e   :  { %1159 = vmatpush3.bf16.msra.mxu1 %v1575_v15 }
 0x35f   :  { %1184 = vmatprep.subr.bf16.mxu1 %v1410_v0 }
 0x414   :  { %v455_v61 = vpop.f32.mrb[4].mxu1 }
 0x415   :  { %v461_v62 = vadd.f32 %v455_v61, %v222_v44  ;;  %v1122_v63 = vpop.f32.mrb[5].mxu1 }
 0x416   :  { %v458_v2 = vpop.f32.mrb[6].mxu1 }
 0x417   :  { %v950_v6 = vmul.f32 -1.442695, %v461_v62  ;;  %v1123_v7 = vpop.f32.mrb[7].mxu1  ;;  %v1419_v62 = vmov 4  }
 0x418   :  { %v237_v63 = vsel %vm1619_vm2, 3, %v1419_v62 }
 0x419   :  { %1298 = vpow2.f32 %v950_v6  ;;  %vm238_vm8 = vcmp.lt.s32.totalorder %v237_v63, %v1675_v4 }
 0x423   :  { %v1299_v9 = vpop.eup %1298 }
 0x424   :  { %v465_v11 = vadd.f32 1.0, %v1299_v9 }
 0x426   :  { %1300 = vrcp.f32 %v465_v11 }
 0x430   :  { %v1301_v16 = vpop.eup %1300 }
 0x431   :  { %v468_v17 = vmul.f32 %v1301_v16, %v1665_v55 }
 0x433   :  { %v469_v18 = vadd.f32 %v468_v17, %v1668_v57 }
 0x435   :  { %474 = vrot.lane.b32.xlu0 %v469_v18, %s1415_s4  ;;  %470 = vrot.lane.b32.xlu1 %v469_v18, %s1414_s1  ;;  %v476_v20 = vmul.f32 %v469_v18, %v419_v52 }
 0x439   :  { %472 = vrot.lane.b32.xlu1 %v469_v18, %s1407_s11 }
 0x4a7   :  { %v475_v44 = vpop.permute.xlu0 %474  ;;  %v471_v19 = vpop.permute.xlu1 %470 }
 0x4a8   :  { %v477_v22 = vmul.f32 %v475_v44, %v471_v19 }
 0x4aa   :  { %v478_v26 = vadd.f32 %v477_v22, %v476_v20 }
 0x4ab   :  { %v473_v34 = vpop.permute.xlu1 %472 }
 0x4ac   :  { %1302 = vtanh.f32 %v478_v26  ;;  %v482_v29 = vsel %vm236_vm7, %v478_v26, %v419_v52 }
 0x4b6   :  { %v1303_v32 = vpop.eup %1302 }
 0x4b7   :  { %v480_v36 = vmul.f32 %v1303_v32, %v473_v34 }
 0x4b9   :  { %v481_v37 = vsel %vm236_vm7, %v480_v36, %v418_v59 }
 0x4ba   :  { %v483_v42 = vpack.c.bf16 %v481_v37, %v481_v37 }
 0x4bc   :  { %1141 = vmatmul.mubr.bf16.vlgmr.msra.gmra.mrb[12].mxu0 %v483_v42 }
 0x4bd   :  { %1165 = vmatpush3.bf16.msra.mxu0 %v1500_v3  ;;  %1180 = vmatprep.mubr.msk.bf16.mxu0 %vm1411_vm0, %v1410_v0 }
 0x4be   :  { %1166 = vmatprep.subr.bf16.mxu0 %v1410_v0 }
 0x4c1   :  { %1167 = vmatpush3.bf16.msra.mxu0 %v1506_v5 }
 0x4c2   :  { %1168 = vmatprep.subr.bf16.mxu0 %v1410_v0 }
 0x4c5   :  { %1169 = vmatpush3.bf16.msra.mxu0 %v1520_v8 }
 0x4c6   :  { %1170 = vmatprep.subr.bf16.mxu0 %v1410_v0 }
 0x4c9   :  { %1171 = vmatpush3.bf16.msra.mxu0 %v1532_v10 }
 0x4ca   :  { %1172 = vmatprep.subr.bf16.mxu0 %v1410_v0 }
 0x4cd   :  { %1173 = vmatpush3.bf16.msra.mxu0 %v1543_v12 }
 0x4ce   :  { %1174 = vmatprep.subr.bf16.mxu0 %v1410_v0 }
 0x4d1   :  { %1175 = vmatpush3.bf16.msra.mxu0 %v1555_v13 }
 0x4d2   :  { %1176 = vmatprep.subr.bf16.mxu0 %v1410_v0 }
 0x4d5   :  { %1177 = vmatpush3.bf16.msra.mxu0 %v1566_v14 }
 0x4d6   :  { %1178 = vmatprep.subr.bf16.mxu0 %v1410_v0 }
 0x4d9   :  { %1179 = vmatpush3.bf16.msra.mxu0 %v1575_v15 }
 0x4da   :  { %1204 = vmatprep.subr.bf16.mxu0 %v1410_v0 }
 0x58f   :  { %v518_v46 = vpop.f32.mrb[12].mxu0 }
 0x590   :  { %v524_v47 = vadd.f32 %v518_v46, %v223_v40  ;;  %v1142_v48 = vpop.f32.mrb[13].mxu0 }
 0x591   :  { %v521_v49 = vpop.f32.mrb[14].mxu0 }
 0x592   :  { %v951_v50 = vmul.f32 -1.442695, %v524_v47  ;;  %v1143_v51 = vpop.f32.mrb[15].mxu0 }
 0x594   :  { %1304 = vpow2.f32 %v951_v50 }
 0x59e   :  { %v1305_v52 = vpop.eup %1304 }
 0x59f   :  { %v528_v53 = vadd.f32 1.0, %v1305_v52 }
 0x5a1   :  { %1306 = vrcp.f32 %v528_v53 }
 0x5ab   :  { %v1307_v54 = vpop.eup %1306 }
 0x5ac   :  { %v531_v56 = vmul.f32 %v1307_v54, %v1665_v55 }
 0x5ae   :  { %v532_v58 = vadd.f32 %v531_v56, %v1668_v57 }
 0x5b0   :  { %537 = vrot.lane.b32.xlu1 %v532_v58, %s1415_s4  ;;  %533 = vrot.lane.b32.xlu0 %v532_v58, %s1414_s1  ;;  %v539_v60 = vmul.f32 %v532_v58, %v482_v29 }
 0x5b4   :  { %535 = vrot.lane.b32.xlu0 %v532_v58, %s1407_s11 }
 0x622   :  { %v538_v40 = vpop.permute.xlu1 %537  ;;  %v534_v59 = vpop.permute.xlu0 %533 }
 0x623   :  { %v540_v61 = vmul.f32 %v538_v40, %v534_v59  ;;  %v1421_v40 = vmov 2  }
 0x624   :  { %v241_v59 = vsel %vm1619_vm2, 5, %v1421_v40 }
 0x625   :  { %v541_v2 = vadd.f32 %v540_v61, %v539_v60  ;;  %vm242_vm10 = vcmp.lt.s32.totalorder %v241_v59, %v1675_v4 }
 0x626   :  { %v536_v9 = vpop.permute.xlu0 %535 }
 0x627   :  { %1308 = vtanh.f32 %v541_v2  ;;  %v545_v6 = vsel %vm238_vm8, %v541_v2, %v482_v29 }
 0x631   :  { %v1309_v7 = vpop.eup %1308 }
 0x632   :  { %v543_v11 = vmul.f32 %v1309_v7, %v536_v9 }
 0x634   :  { %v544_v16 = vsel %vm238_vm8, %v543_v11, %v481_v37  ;;  %v1420_v37 = vmov 3  }
 0x635   :  { %v546_v17 = vpack.c.bf16 %v544_v16, %v544_v16  ;;  %v239_v42 = vsel %vm1619_vm2, 4, %v1420_v37 }
 0x636   :  { %vm240_vm9 = vcmp.lt.s32.totalorder %v239_v42, %v1675_v4 }
 0x637   :  { %1161 = vmatmul.mubr.bf16.vlgmr.msra.gmra.mrb[8].mxu1 %v546_v17 }
 0x638   :  { %1185 = vmatpush3.bf16.msra.mxu1 %v1500_v3  ;;  %1200 = vmatprep.mubr.msk.bf16.mxu1 %vm1411_vm0, %v1410_v0 }
 0x639   :  { %1186 = vmatprep.subr.bf16.mxu1 %v1410_v0 }
 0x63c   :  { %1187 = vmatpush3.bf16.msra.mxu1 %v1506_v5 }
 0x63d   :  { %1188 = vmatprep.subr.bf16.mxu1 %v1410_v0 }
 0x640   :  { %1189 = vmatpush3.bf16.msra.mxu1 %v1520_v8 }
 0x641   :  { %1190 = vmatprep.subr.bf16.mxu1 %v1410_v0 }
 0x644   :  { %1191 = vmatpush3.bf16.msra.mxu1 %v1532_v10 }
 0x645   :  { %1192 = vmatprep.subr.bf16.mxu1 %v1410_v0 }
 0x648   :  { %1193 = vmatpush3.bf16.msra.mxu1 %v1543_v12 }
 0x649   :  { %1194 = vmatprep.subr.bf16.mxu1 %v1410_v0 }
 0x64c   :  { %1195 = vmatpush3.bf16.msra.mxu1 %v1555_v13 }
 0x64d   :  { %1196 = vmatprep.subr.bf16.mxu1 %v1410_v0 }
 0x650   :  { %1197 = vmatpush3.bf16.msra.mxu1 %v1566_v14 }
 0x651   :  { %1198 = vmatprep.subr.bf16.mxu1 %v1410_v0 }
 0x654   :  { %1199 = vmatpush3.bf16.msra.mxu1 %v1575_v15 }
 0x655   :  { %1224 = vmatprep.subr.bf16.mxu1 %v1410_v0 }
 0x70a   :  { %v581_v18 = vpop.f32.mrb[8].mxu1 }
 0x70b   :  { %v587_v44 = vadd.f32 %v581_v18, %v224_v41  ;;  %v1162_v19 = vpop.f32.mrb[9].mxu1 }
 0x70c   :  { %v584_v20 = vpop.f32.mrb[10].mxu1 }
 0x70d   :  { %v952_v22 = vmul.f32 -1.442695, %v587_v44  ;;  %v1163_v23 = vpop.f32.mrb[11].mxu1 }
 0x70f   :  { %1310 = vpow2.f32 %v952_v22 }
 0x719   :  { %v1311_v25 = vpop.eup %1310 }
 0x71a   :  { %v591_v26 = vadd.f32 1.0, %v1311_v25 }
 0x71c   :  { %1312 = vrcp.f32 %v591_v26 }
 0x726   :  { %v1313_v29 = vpop.eup %1312 }
 0x727   :  { %v594_v32 = vmul.f32 %v1313_v29, %v1665_v55  ;;  %v1422_v29 = vmov 1  }
 0x729   :  { %v595_v34 = vadd.f32 %v594_v32, %v1668_v57  ;;  %v243_v32 = vsel %vm1619_vm2, 6, %v1422_v29 }
 0x72a   :  { %vm244_vm11 = vcmp.lt.s32.totalorder %v243_v32, %v1675_v4 }
 0x72b   :  { %600 = vrot.lane.b32.xlu0 %v595_v34, %s1415_s4  ;;  %596 = vrot.lane.b32.xlu1 %v595_v34, %s1414_s1  ;;  %v602_v41 = vmul.f32 %v595_v34, %v545_v6 }
 0x72f   :  { %598 = vrot.lane.b32.xlu1 %v595_v34, %s1407_s11 }
 0x79d   :  { %v601_v24 = vpop.permute.xlu0 %600  ;;  %v597_v33 = vpop.permute.xlu1 %596 }
 0x79e   :  { %v603_v36 = vmul.f32 %v601_v24, %v597_v33 }
 0x7a0   :  { %v604_v46 = vadd.f32 %v603_v36, %v602_v41 }
 0x7a1   :  { %v599_v49 = vpop.permute.xlu1 %598 }
 0x7a2   :  { %1314 = vtanh.f32 %v604_v46  ;;  %v608_v47 = vsel %vm240_vm9, %v604_v46, %v545_v6  ;;  %v1278_v46 = vld [vmem:[#allocation5] sm:$0xff]  }
 0x7ac   :  { %v1315_v48 = vpop.eup %1314 }
 0x7ad   :  { %v606_v50 = vmul.f32 %v1315_v48, %v599_v49  ;;  %v1280_v48 = vld [vmem:[#allocation5 + $0x10] sm:$0xff]  }
 0x7af   :  { %v607_v51 = vsel %vm240_vm9, %v606_v50, %v544_v16 }
 0x7b0   :  { %v609_v52 = vpack.c.bf16 %v607_v51, %v607_v51 }
 0x7b2   :  { %1181 = vmatmul.mubr.bf16.vlgmr.msra.gmra.mrb[16].mxu0 %v609_v52 }
 0x7b3   :  { %1205 = vmatpush3.bf16.msra.mxu0 %v1500_v3  ;;  %1220 = vmatprep.mubr.msk.bf16.mxu0 %vm1411_vm0, %v1410_v0 }
 0x7b4   :  { %1206 = vmatprep.subr.bf16.mxu0 %v1410_v0 }
 0x7b7   :  { %1207 = vmatpush3.bf16.msra.mxu0 %v1506_v5 }
 0x7b8   :  { %1208 = vmatprep.subr.bf16.mxu0 %v1410_v0 }
 0x7bb   :  { %1209 = vmatpush3.bf16.msra.mxu0 %v1520_v8 }
 0x7bc   :  { %1210 = vmatprep.subr.bf16.mxu0 %v1410_v0 }
 0x7bf   :  { %1211 = vmatpush3.bf16.msra.mxu0 %v1532_v10 }
 0x7c0   :  { %1212 = vmatprep.subr.bf16.mxu0 %v1410_v0 }
 0x7c3   :  { %1213 = vmatpush3.bf16.msra.mxu0 %v1543_v12 }
 0x7c4   :  { %1214 = vmatprep.subr.bf16.mxu0 %v1410_v0 }
 0x7c7   :  { %1215 = vmatpush3.bf16.msra.mxu0 %v1555_v13 }
 0x7c8   :  { %1216 = vmatprep.subr.bf16.mxu0 %v1410_v0 }
 0x7cb   :  { %1217 = vmatpush3.bf16.msra.mxu0 %v1566_v14 }
 0x7cc   :  { %1218 = vmatprep.subr.bf16.mxu0 %v1410_v0 }
 0x7cf   :  { %1219 = vmatpush3.bf16.msra.mxu0 %v1575_v15 }
 0x885   :  { %v644_v3 = vpop.f32.mrb[16].mxu0 }
 0x886   :  { %v650_v5 = vadd.f32 %v644_v3, %v225_v45  ;;  %v1182_v8 = vpop.f32.mrb[17].mxu0 }
 0x887   :  { %v647_v10 = vpop.f32.mrb[18].mxu0 }
 0x888   :  { %v953_v12 = vmul.f32 -1.442695, %v650_v5  ;;  %v1183_v53 = vpop.f32.mrb[19].mxu0 }
 0x889   :  { %v1282_v53 = vld [vmem:[#allocation5 + $0x20] sm:$0xff]  }
 0x88a   :  { %1316 = vpow2.f32 %v953_v12  ;;  %v1281_v12 = vld [vmem:[#allocation5 + $0x18] sm:$0xff]  }
 0x894   :  { %v1317_v13 = vpop.eup %1316 }
 0x895   :  { %v654_v54 = vadd.f32 1.0, %v1317_v13  ;;  %v1283_v13 = vld [vmem:[#allocation5 + $0x28] sm:$0xff]  }
 0x897   :  { %1318 = vrcp.f32 %v654_v54 }
 0x8a1   :  { %v1319_v14 = vpop.eup %1318 }
 0x8a2   :  { %v657_v56 = vmul.f32 %v1319_v14, %v1665_v55 }
 0x8a4   :  { %v658_v15 = vadd.f32 %v657_v56, %v1668_v57  ;;  %v1285_v56 = vld [vmem:[#allocation5 + $0x38] sm:$0xff]  }
 0x8a6   :  { %663 = vrot.lane.b32.xlu1 %v658_v15, %s1415_s4  ;;  %659 = vrot.lane.b32.xlu0 %v658_v15, %s1414_s1  ;;  %v665_v45 = vmul.f32 %v658_v15, %v608_v47 }
 0x8aa   :  { %661 = vrot.lane.b32.xlu0 %v658_v15, %s1407_s11 }
 0x918   :  { %v664_v21 = vpop.permute.xlu1 %663  ;;  %v660_v39 = vpop.permute.xlu0 %659 }
 0x919   :  { %v666_v58 = vmul.f32 %v664_v21, %v660_v39 }
 0x91b   :  { %v667_v60 = vadd.f32 %v666_v58, %v665_v45 }
 0x91c   :  { %v662_v63 = vpop.permute.xlu0 %661 }
 0x91d   :  { %1320 = vtanh.f32 %v667_v60  ;;  %v671_v61 = vsel %vm242_vm10, %v667_v60, %v608_v47  ;;  %v1279_v47 = vld [vmem:[#allocation5 + $0x8] sm:$0xff]   ;;  %v956_v60 = vld [vmem:[%s1898_s6] ss:$0 sm:$0xff] }
 0x927   :  { %v1321_v62 = vpop.eup %1320 }
 0x928   :  { %v669_v2 = vmul.f32 %v1321_v62, %v662_v63 }
 0x92a   :  { %v670_v6 = vsel %vm242_vm10, %v669_v2, %v607_v51 }
 0x92b   :  { %v672_v7 = vpack.c.bf16 %v670_v6, %v670_v6 }
 0x92d   :  { %1201 = vmatmul.mubr.bf16.vlgmr.msra.gmra.mrb[12].mxu1 %v672_v7 }
 0x92e   :  { %1240 = vmatprep.mubr.msk.bf16.mxu1 %vm1411_vm0, %v1410_v0  ;;  %1225 = vmatpush3.bf16.msra.mxu1 %v1278_v46 }
 0x92f   :  { %1226 = vmatprep.subr.bf16.mxu1 %v1410_v0 }
 0x932   :  { %1227 = vmatpush3.bf16.msra.mxu1 %v1279_v47 }
 0x933   :  { %1228 = vmatprep.subr.bf16.mxu1 %v1410_v0 }
 0x936   :  { %1229 = vmatpush3.bf16.msra.mxu1 %v1280_v48 }
 0x937   :  { %1230 = vmatprep.subr.bf16.mxu1 %v1410_v0 }
 0x93a   :  { %1231 = vmatpush3.bf16.msra.mxu1 %v1281_v12 }
 0x93b   :  { %1232 = vmatprep.subr.bf16.mxu1 %v1410_v0 }
 0x93e   :  { %1233 = vmatpush3.bf16.msra.mxu1 %v1282_v53 }
 0x93f   :  { %1234 = vmatprep.subr.bf16.mxu1 %v1410_v0 }
 0x942   :  { %1235 = vmatpush3.bf16.msra.mxu1 %v1283_v13 }
 0x943   :  { %1236 = vmatprep.subr.bf16.mxu1 %v1410_v0 }
 0xa00   :  { %v707_v9 = vpop.f32.mrb[12].mxu1 }
 0xa01   :  { %v713_v11 = vadd.f32 %v707_v9, %v226_v38  ;;  %v1202_v16 = vpop.f32.mrb[13].mxu1 }
 0xa02   :  { %v710_v17 = vpop.f32.mrb[14].mxu1 }
 0xa03   :  { %v954_v18 = vmul.f32 -1.442695, %v713_v11  ;;  %v1203_v44 = vpop.f32.mrb[15].mxu1 }
 0xa05   :  { %1322 = vpow2.f32 %v954_v18 }
 0xa0f   :  { %v1323_v19 = vpop.eup %1322 }
 0xa10   :  { %v717_v20 = vadd.f32 1.0, %v1323_v19 }
 0xa12   :  { %1324 = vrcp.f32 %v717_v20 }
 0xa1c   :  { %v1325_v22 = vpop.eup %1324 }
 0xa1d   :  { %v720_v23 = vmul.f32 %v1325_v22, %v1665_v55 }
 0xa1f   :  { %v721_v25 = vadd.f32 %v720_v23, %v1668_v57 }
 0xa21   :  { %726 = vrot.lane.b32.xlu0 %v721_v25, %s1415_s4  ;;  %722 = vrot.lane.b32.xlu1 %v721_v25, %s1414_s1  ;;  %v728_v38 = vmul.f32 %v721_v25, %v671_v61 }
 0xa25   :  { %724 = vrot.lane.b32.xlu1 %v721_v25, %s1407_s11 }
 0xa93   :  { %v727_v27 = vpop.permute.xlu0 %726  ;;  %v723_v31 = vpop.permute.xlu1 %722 }
 0xa94   :  { %v729_v26 = vmul.f32 %v727_v27, %v723_v31 }
 0xa96   :  { %v730_v34 = vadd.f32 %v729_v26, %v728_v38 }
 0xa97   :  { %v725_v41 = vpop.permute.xlu1 %724 }
 0xa98   :  { %1326 = vtanh.f32 %v730_v34  ;;  %v734_v24 = vsel %vm244_vm11, %v730_v34, %v671_v61 }
 0xaa2   :  { %v1327_v33 = vpop.eup %1326 }
 0xaa3   :  { %v732_v36 = vmul.f32 %v1327_v33, %v725_v41 }
 0xaa5   :  { %v733_v37 = vsel %vm244_vm11, %v732_v36, %v670_v6 }
 0xaa6   :  { %v735_v42 = vpack.c.bf16 %v733_v37, %v733_v37 }
 0xaa8   :  { %1221 = vmatmul.mubr.bf16.vlgmr.msra.gmra.mrb[20].mxu0 %v735_v42 }
 0xb7b   :  { %v770_v49 = vpop.f32.mrb[20].mxu0 }
 0xb7c   :  { %v776_v50 = vadd.f32 %v770_v49, %v227_v43  ;;  %v1222_v51 = vpop.f32.mrb[21].mxu0  ;;  %v1284_v43 = vld [vmem:[#allocation5 + $0x30] sm:$0xff]  }
 0xb7d   :  { %v773_v52 = vpop.f32.mrb[22].mxu0  ;;  %1237 = vmatpush3.bf16.msra.mxu1 %v1284_v43 }
 0xb7e   :  { %v955_v3 = vmul.f32 -1.442695, %v776_v50  ;;  %v1223_v5 = vpop.f32.mrb[23].mxu0  ;;  %1238 = vmatprep.subr.bf16.mxu1 %v1410_v0 }
 0xb80   :  { %1328 = vpow2.f32 %v955_v3 }
 0xb81   :  { %1239 = vmatpush3.bf16.msra.mxu1 %v1285_v56 }
 0xb8a   :  { %v1329_v8 = vpop.eup %1328 }
 0xb8b   :  { %v780_v10 = vadd.f32 1.0, %v1329_v8 }
 0xb8d   :  { %1330 = vrcp.f32 %v780_v10 }
 0xb97   :  { %v1331_v54 = vpop.eup %1330 }
 0xb98   :  { %v783_v30 = vmul.f32 %v1331_v54, %v1665_v55 }
 0xb9a   :  { %v784_v35 = vadd.f32 %v783_v30, %v1668_v57  ;;  %v245_v57 = vsel %vm1619_vm2, 7, %v1412_v1 }
 0xb9b   :  { %vm246_vm12 = vcmp.lt.s32.totalorder %v245_v57, %v1675_v4 }
 0xb9c   :  { %789 = vrot.lane.b32.xlu1 %v784_v35, %s1415_s4  ;;  %785 = vrot.lane.b32.xlu0 %v784_v35, %s1414_s1  ;;  %v791_v14 = vmul.f32 %v784_v35, %v734_v24 }
 0xba0   :  { %787 = vrot.lane.b32.xlu0 %v784_v35, %s1407_s11 }
 0xc0e   :  { %v790_v15 = vpop.permute.xlu1 %789  ;;  %v786_v55 = vpop.permute.xlu0 %785 }
 0xc0f   :  { %v792_v21 = vmul.f32 %v790_v15, %v786_v55 }
 0xc11   :  { %v793_v39 = vadd.f32 %v792_v21, %v791_v14 }
 0xc12   :  { %v788_v58 = vpop.permute.xlu0 %787 }
 0xc13   :  { %1332 = vtanh.f32 %v793_v39 }
 0xc1d   :  { %v1333_v45 = vpop.eup %1332 }
 0xc1e   :  { %v795_v40 = vmul.f32 %v1333_v45, %v788_v58 }
 0xc20   :  { %v796_v59 = vsel %vm246_vm12, %v795_v40, %v733_v37 }
 0xc21   :  { %v797_v0 = vpack.c.bf16 %v796_v59, %v796_v59 }
 0xc23   :  { %1241 = vmatmul.mubr.bf16.vlgmr.msra.gmra.mrb[16].mxu1 %v797_v0 }
 0xcf6   :  { %v903_v61 = vpop.f32.mrb[16].mxu1 }
 0xcf7   :  { %v904_v62 = vadd.f32 %v956_v60, %v903_v61  ;;  %v1242_v63 = vpop.f32.mrb[17].mxu1 }
 0xcf8   :  { %v906_v28 = vpop.f32.mrb[18].mxu1 }
 0xcf9   :  { %909 = vst [vmem:[#allocation7] sm:$0xff] %v904_v62  ;;  %v1243_v1 = vpop.f32.mrb[19].mxu1 }
 0xcfa   :  { %1389 = shalt.err (!%p1386_p6)
}
 0xcfb   :  { %s1390_s6 = scalar_lea.hbm %s1899_s7, 128 }
 0xcfc   :  { %p1391_p7 = scmp.ne.s32.totalorder %s1899_s7, %s1390_s6  ;;  %p1394_p8 = scmp.lt.u32.totalorder %s1390_s6, %s1899_s7 }
 0xcfe   :  { %p1396_p9 = pnand %p1394_p8, %p1391_p7 }
 0xd00   :  { %1399 = shalt.err (!%p1396_p9)
}
 0xd01   :  { %919 = dma.vmem_to_hbm [thread:$0]  %s917_s29, 128, %s1899_s7, [#allocation4]  }
 0xd02   :  { %1404 = dma.done.wait [#allocation4], 128  }
 0xd03   :  { %1405 = vsyncadd [#allocation4], 4294967168 }
 0xd04   :  { %923 = vsyncpa [#allocation3], 1 }
 0xd05   :  { %924 = vsyncpa [#allocation6], 1 }
 0xd06   :  { %925 = vsyncpa [#allocation4], 1 }

</bundles_post_ra>
